<compile_context>
chip_gen: v7x
topology: tpu7x:2x2x1
jax: 0.10.0
libtpu: 0.0.40
codegen_flags: <defaults>
</compile_context>

<pallas_src>
import functools

import jax
import jax.numpy as jnp
from jax.experimental import pallas as pl
from jax.experimental.pallas import tpu as pltpu

_SUBLANE = 8   # f32 sublane multiple for the batch (second-minor) dim


def _round_up(n, m):
    return ((n + m - 1) // m) * m


def _num_tensorcores_per_chip():
    """Best-effort TensorCores-per-chip (v7x: 2, v5e/v6e: 1). Never raises."""
    try:
        dev = jax.devices()[0]
        n = getattr(dev, "num_cores", None) or getattr(dev, "core_count", None)
        if n:
            return max(1, int(n))
        kind = str(getattr(dev, "device_kind", "")).lower()
        if "v7" in kind or "7x" in kind:
            return 2
    except Exception:
        pass
    return 1


def _rectified_flow_kernel(x_ref, w1_ref, b1_ref, w2_ref, b2_ref,
                           w3_ref, b3_ref, z_ref):
    """One batch tile of z = x + MLP(x)  (scale is pre-folded into w3/b3)."""
    x = x_ref[...].astype(jnp.float32)                                 # (bt, D)

    # Linear 1 + ReLU  (f32 MXU matmul, f32 accumulate)
    h = jnp.dot(x, w1_ref[...], preferred_element_type=jnp.float32) + b1_ref[...]
    h = jnp.maximum(h, 0.0)

    # Linear 2 + ReLU
    h = jnp.dot(h, w2_ref[...], preferred_element_type=jnp.float32) + b2_ref[...]
    h = jnp.maximum(h, 0.0)

    # Linear 3 (velocity field, already scaled by `scale`)
    v = jnp.dot(h, w3_ref[...], preferred_element_type=jnp.float32) + b3_ref[...]

    # Residual update: z = x + scale * network(x)
    z_ref[...] = (x + v).astype(z_ref.dtype)


@functools.partial(jax.jit, static_argnames=("num_batch_tiles",))
def _forward_impl(x, kp, num_batch_tiles):
    B, D = x.shape
    H = kp["w1"].shape[1]

    # Even batch tiling: `num_batch_tiles` tiles of bt rows, bt multiple of 8.
    bt = _round_up(pl.cdiv(B, num_batch_tiles), _SUBLANE)
    Bp = _round_up(B, bt)
    grid = (Bp // bt,)

    xin = x
    if Bp != B:   # only the batch dim is ever padded (< bt rows total)
        xin = jnp.pad(xin, ((0, Bp - B), (0, 0)))

    cost = pl.CostEstimate(
        flops=2 * Bp * (D * H + H * H + H * D),
        transcendentals=0,
        bytes_accessed=(2 * Bp * D + D * H + H * H + H * D + 2 * H + D) * 4,
    )

    z_full = pl.pallas_call(
        _rectified_flow_kernel,
        out_shape=jax.ShapeDtypeStruct((Bp, D), x.dtype),
        grid=grid,
        in_specs=[
            pl.BlockSpec((bt, D), lambda i: (i, 0)),   # x tile (unpadded lanes)
            pl.BlockSpec((D, H), lambda i: (0, 0)),    # w1 (resident)
            pl.BlockSpec((1, H), lambda i: (0, 0)),    # b1
            pl.BlockSpec((H, H), lambda i: (0, 0)),    # w2
            pl.BlockSpec((1, H), lambda i: (0, 0)),    # b2
            pl.BlockSpec((H, D), lambda i: (0, 0)),    # w3 (scale folded in)
            pl.BlockSpec((1, D), lambda i: (0, 0)),    # b3 (scale folded in)
        ],
        out_specs=pl.BlockSpec((bt, D), lambda i: (i, 0)),
        compiler_params=pltpu.CompilerParams(
            dimension_semantics=("parallel",),
            # vmem_limit_bytes intentionally omitted: working set ~2 MiB,
            # far below the default scoped VMEM limit on v5e/v6e/v7x.
        ),
        cost_estimate=cost,
    )(xin, kp["w1"], kp["b1"], kp["w2"], kp["b2"], kp["w3"], kp["b3"])

    z = z_full if Bp == B else z_full[:B]
    # Eval mode: log_det is identically zero.
    # TODO(synk): training-mode Hutchinson trace estimator requires autodiff
    # through the flow and is intentionally not implemented in-kernel.
    log_det = jnp.zeros((B,), dtype=x.dtype)
    return z, log_det


def rectified_flow_forward(x, kernel_params, num_batch_tiles=None):
    """Eval-mode RectifiedFlow forward: returns (z, log_det)."""
    if num_batch_tiles is None:
        num_batch_tiles = _num_tensorcores_per_chip()
    B = x.shape[0]
    num_batch_tiles = max(1, min(int(num_batch_tiles), max(1, B // _SUBLANE)))
    return _forward_impl(x, kernel_params, num_batch_tiles)


def prepare_params(params):
    """One-time (init-time) parameter prep: fold `scale` into the last layer.

    z = x + scale*(h @ w3 + b3) == x + h @ (scale*w3) + (scale*b3), so the
    kernel never touches `scale` and the wrapper never pads or casts weights.
    """
    scale = jnp.asarray(params["scale"], jnp.float32).reshape(())
    f32 = lambda a: jnp.asarray(a, jnp.float32)
    return {
        "w1": f32(params["w1"]), "b1": f32(params["b1"]),
        "w2": f32(params["w2"]), "b2": f32(params["b2"]),
        "w3": f32(params["w3"]) * scale, "b3": f32(params["b3"]) * scale,
    }


def init_params(key, input_dim, hidden_dim):
    """Deterministic init mirroring nn.Linear (uniform +-1/sqrt(fan_in))."""
    ks = jax.random.split(key, 6)

    def linear(kw, kb, fan_in, fan_out):
        bound = 1.0 / jnp.sqrt(fan_in)
        w = jax.random.uniform(kw, (fan_in, fan_out), jnp.float32, -bound, bound)
        b = jax.random.uniform(kb, (1, fan_out), jnp.float32, -bound, bound)
        return w, b

    w1, b1 = linear(ks[0], ks[1], input_dim, hidden_dim)
    w2, b2 = linear(ks[2], ks[3], hidden_dim, hidden_dim)
    w3, b3 = linear(ks[4], ks[5], hidden_dim, input_dim)
    scale = jnp.full((1,), 0.1, dtype=jnp.float32)   # nn.Parameter(ones(1)*0.1)
    return {"w1": w1, "b1": b1, "w2": w2, "b2": b2,
            "w3": w3, "b3": b3, "scale": scale}


def reference_forward(x, p):
    """Pure-JAX f32 (highest-precision) reference for correctness check."""
    hp = jax.lax.Precision.HIGHEST
    h = jnp.maximum(jnp.dot(x, p["w1"], precision=hp) + p["b1"], 0.0)
    h = jnp.maximum(jnp.dot(h, p["w2"], precision=hp) + p["b2"], 0.0)
    v = jnp.dot(h, p["w3"], precision=hp) + p["b3"]
    z = x + p["scale"][0] * v
    return z, jnp.zeros((x.shape[0],), x.dtype)


if __name__ == "__main__":
    key = jax.random.PRNGKey(0)
    k_x, k_p = jax.random.split(key)

    # Small model dims implied by the module; batch large enough that a dual-TC
    # chip (v7x) gets two even parallel tiles while v5e/v6e use a single step.
    batch, input_dim, hidden_dim = 512, 16, 32
    x = jax.random.normal(k_x, (batch, input_dim), dtype=jnp.float32)
    params = init_params(k_p, input_dim, hidden_dim)
    kernel_params = prepare_params(params)      # one-time prep, outside hot path

    z, log_det = rectified_flow_forward(x, kernel_params)
    jax.block_until_ready((z, log_det))

    z_ref, log_det_ref = reference_forward(x, params)
    max_err = float(jnp.max(jnp.abs(z - z_ref)))
    assert z.shape == z_ref.shape and log_det.shape == (batch,)
    assert jnp.allclose(z, z_ref, atol=1e-3, rtol=1e-3), max_err
    assert jnp.allclose(log_det, log_det_ref)

    print("KERNEL_OK")
</pallas_src>

<mosaic_0001>
module attributes {stable_mosaic.version = 11 : i64} {
  func.func @_rectified_flow_kernel(%arg0: i32, %arg1: memref<512x16xf32, #tpu.memory_space<vmem>>, %arg2: memref<16x32xf32, #tpu.memory_space<vmem>>, %arg3: memref<1x32xf32, #tpu.memory_space<vmem>>, %arg4: memref<32x32xf32, #tpu.memory_space<vmem>>, %arg5: memref<1x32xf32, #tpu.memory_space<vmem>>, %arg6: memref<32x16xf32, #tpu.memory_space<vmem>>, %arg7: memref<1x16xf32, #tpu.memory_space<vmem>>, %arg8: memref<512x16xf32, #tpu.memory_space<vmem>>) attributes {dimension_semantics = [#tpu.dimension_semantics<parallel>], iteration_bounds = array<i64: 1>, scalar_prefetch = 0 : i64, scratch_operands = 0 : i64, tpu.core_type = #tpu.core_type<tc>, window_params = [{transform_indices = @transform_0, window_bounds = array<i64: 512, 16>}, {pipeline_mode = #tpu.pipeline_mode<synchronous>, transform_indices = @transform_1, window_bounds = array<i64: 16, 32>}, {pipeline_mode = #tpu.pipeline_mode<synchronous>, transform_indices = @transform_2, window_bounds = array<i64: 1, 32>}, {pipeline_mode = #tpu.pipeline_mode<synchronous>, transform_indices = @transform_3, window_bounds = array<i64: 32, 32>}, {pipeline_mode = #tpu.pipeline_mode<synchronous>, transform_indices = @transform_4, window_bounds = array<i64: 1, 32>}, {pipeline_mode = #tpu.pipeline_mode<synchronous>, transform_indices = @transform_5, window_bounds = array<i64: 32, 16>}, {pipeline_mode = #tpu.pipeline_mode<synchronous>, transform_indices = @transform_6, window_bounds = array<i64: 1, 16>}, {transform_indices = @transform_7, window_bounds = array<i64: 512, 16>}]} {
    %c0 = arith.constant 0 : index
    %c0_0 = arith.constant 0 : index
    %0 = vector.load %arg1[%c0, %c0_0] : memref<512x16xf32, #tpu.memory_space<vmem>>, vector<512x16xf32>
    %c0_1 = arith.constant 0 : index
    %c0_2 = arith.constant 0 : index
    %1 = vector.load %arg2[%c0_1, %c0_2] : memref<16x32xf32, #tpu.memory_space<vmem>>, vector<16x32xf32>
    %cst = arith.constant dense<0.000000e+00> : vector<512x32xf32>
    %2 = tpu.matmul %0, %1, %cst {dimension_numbers = #tpu.dot_dimension_numbers<[1], [0], [0], [1], [0, 0, 1, 1], [], []>} : vector<512x16xf32>, vector<16x32xf32>, vector<512x32xf32> -> vector<512x32xf32>
    %c0_3 = arith.constant 0 : index
    %c0_4 = arith.constant 0 : index
    %3 = vector.load %arg3[%c0_3, %c0_4] : memref<1x32xf32, #tpu.memory_space<vmem>>, vector<1x32xf32>
    %4 = vector.broadcast %3 : vector<1x32xf32> to vector<512x32xf32>
    %5 = arith.addf %2, %4 : vector<512x32xf32>
    %cst_5 = arith.constant 0.000000e+00 : f32
    %6 = vector.broadcast %cst_5 : f32 to vector<512x32xf32>
    %7 = arith.maximumf %5, %6 : vector<512x32xf32>
    %c0_6 = arith.constant 0 : index
    %c0_7 = arith.constant 0 : index
    %8 = vector.load %arg4[%c0_6, %c0_7] : memref<32x32xf32, #tpu.memory_space<vmem>>, vector<32x32xf32>
    %cst_8 = arith.constant dense<0.000000e+00> : vector<512x32xf32>
    %9 = tpu.matmul %7, %8, %cst_8 {dimension_numbers = #tpu.dot_dimension_numbers<[1], [0], [0], [1], [0, 0, 1, 1], [], []>} : vector<512x32xf32>, vector<32x32xf32>, vector<512x32xf32> -> vector<512x32xf32>
    %c0_9 = arith.constant 0 : index
    %c0_10 = arith.constant 0 : index
    %10 = vector.load %arg5[%c0_9, %c0_10] : memref<1x32xf32, #tpu.memory_space<vmem>>, vector<1x32xf32>
    %11 = vector.broadcast %10 : vector<1x32xf32> to vector<512x32xf32>
    %12 = arith.addf %9, %11 : vector<512x32xf32>
    %cst_11 = arith.constant 0.000000e+00 : f32
    %13 = vector.broadcast %cst_11 : f32 to vector<512x32xf32>
    %14 = arith.maximumf %12, %13 : vector<512x32xf32>
    %c0_12 = arith.constant 0 : index
    %c0_13 = arith.constant 0 : index
    %15 = vector.load %arg6[%c0_12, %c0_13] : memref<32x16xf32, #tpu.memory_space<vmem>>, vector<32x16xf32>
    %cst_14 = arith.constant dense<0.000000e+00> : vector<512x16xf32>
    %16 = tpu.matmul %14, %15, %cst_14 {dimension_numbers = #tpu.dot_dimension_numbers<[1], [0], [0], [1], [0, 0, 1, 1], [], []>} : vector<512x32xf32>, vector<32x16xf32>, vector<512x16xf32> -> vector<512x16xf32>
    %c0_15 = arith.constant 0 : index
    %c0_16 = arith.constant 0 : index
    %17 = vector.load %arg7[%c0_15, %c0_16] : memref<1x16xf32, #tpu.memory_space<vmem>>, vector<1x16xf32>
    %18 = vector.broadcast %17 : vector<1x16xf32> to vector<512x16xf32>
    %19 = arith.addf %16, %18 : vector<512x16xf32>
    %20 = arith.addf %0, %19 : vector<512x16xf32>
    %c0_17 = arith.constant 0 : index
    %c0_18 = arith.constant 0 : index
    %21 = vector.load %arg8[%c0_17, %c0_18] : memref<512x16xf32, #tpu.memory_space<vmem>>, vector<512x16xf32>
    tpu.vector_store %arg8[%c0_17, %c0_18], %20 {strides = array<i32>} : memref<512x16xf32, #tpu.memory_space<vmem>>, vector<512x16xf32>,
    return
  }
  func.func @transform_0(%arg0: i32) -> (i32, i32) {
    %c0_i32 = arith.constant 0 : i32
    %c0_i32_0 = arith.constant 0 : i32
    return %arg0, %c0_i32 : i32, i32
  }
  func.func @transform_1(%arg0: i32) -> (i32, i32) {
    %c0_i32 = arith.constant 0 : i32
    %c0_i32_0 = arith.constant 0 : i32
    %c0_i32_1 = arith.constant 0 : i32
    return %c0_i32, %c0_i32_0 : i32, i32
  }
  func.func @transform_2(%arg0: i32) -> (i32, i32) {
    %c0_i32 = arith.constant 0 : i32
    %c0_i32_0 = arith.constant 0 : i32
    %c0_i32_1 = arith.constant 0 : i32
    return %c0_i32, %c0_i32_0 : i32, i32
  }
  func.func @transform_3(%arg0: i32) -> (i32, i32) {
    %c0_i32 = arith.constant 0 : i32
    %c0_i32_0 = arith.constant 0 : i32
    %c0_i32_1 = arith.constant 0 : i32
    return %c0_i32, %c0_i32_0 : i32, i32
  }
  func.func @transform_4(%arg0: i32) -> (i32, i32) {
    %c0_i32 = arith.constant 0 : i32
    %c0_i32_0 = arith.constant 0 : i32
    %c0_i32_1 = arith.constant 0 : i32
    return %c0_i32, %c0_i32_0 : i32, i32
  }
  func.func @transform_5(%arg0: i32) -> (i32, i32) {
    %c0_i32 = arith.constant 0 : i32
    %c0_i32_0 = arith.constant 0 : i32
    %c0_i32_1 = arith.constant 0 : i32
    return %c0_i32, %c0_i32_0 : i32, i32
  }
  func.func @transform_6(%arg0: i32) -> (i32, i32) {
    %c0_i32 = arith.constant 0 : i32
    %c0_i32_0 = arith.constant 0 : i32
    %c0_i32_1 = arith.constant 0 : i32
    return %c0_i32, %c0_i32_0 : i32, i32
  }
  func.func @transform_7(%arg0: i32) -> (i32, i32) {
    %c0_i32 = arith.constant 0 : i32
    %c0_i32_0 = arith.constant 0 : i32
    return %arg0, %c0_i32 : i32, i32
  }
}

</mosaic_0001>

<bundles_post_ra>
// kernel: _forward_impl.1
= control target key start
LH: loop header
LB: loop body
LE: loop exit
PB: predicated region body
PF: predicated region fallthrough
CT: control target
= control target key end

     0   :  { %vm99_vm0 = vcmask 130048   ;;  %vm752_vm1 = vcmask 261120   ;;  %s4110_s1 = inlined_call_operand.vmem [shape: f32[16,32], index: 1, kind: input, shape index: {}]   ;;  %s4111_s0 = inlined_call_operand.vmem [shape: f32[512,16], index: 0, kind: input, shape index: {}]   ;;  %s4112_s3 = inlined_call_operand.vmem [shape: f32[32,32], index: 3, kind: input, shape index: {}]   ;;  %s4113_s2 = inlined_call_operand.vmem [shape: f32[1,32], index: 2, kind: input, shape index: {}]   ;;  %s4114_s5 = inlined_call_operand.vmem [shape: f32[32,16], index: 5, kind: input, shape index: {}]   ;;  %s4115_s4 = inlined_call_operand.vmem [shape: f32[1,32], index: 4, kind: input, shape index: {}]   ;;  %s4116_s6 = inlined_call_operand.vmem [shape: f32[1,16], index: 6, kind: input, shape index: {}]   ;;  %s4117_s7 = inlined_call_operand.vmem [shape: f32[512,16], index: 7, kind: output, shape index: {}]  }
   0x1   :  { %v90_v0 = vld [vmem:[%s4110_s1] sm:$0xff]  ;;  %v91_v1 = vld [vmem:[%s4110_s1 + $0x8] sm:$0xff]  ;;  %v28_v5 = vld [vmem:[%s4111_s0 + $0x10] sm:$0xff] }
   0x2   :  { %v26_v2 = vld [vmem:[%s4111_s0] sm:$0xff]  ;;  %v2819_v3 = vpack.c.bf16 %v91_v1, %v90_v0  ;;  %v27_v4 = vld [vmem:[%s4111_s0 + $0x8] sm:$0xff]  ;;  %v29_v6 = vld [vmem:[%s4111_s0 + $0x18] sm:$0xff] }
   0x3   :  { %2515 = vmatprep.mubr.msk.f32.mxu0 %vm99_vm0, %v26_v2  ;;  %v30_v7 = vld [vmem:[%s4111_s0 + $0x20] sm:$0xff]  ;;  %v59_v9 = vld [vmem:[%s4111_s0 + $0x108] sm:$0xff]  ;;  %v60_v11 = vld [vmem:[%s4111_s0 + $0x110] sm:$0xff] }
   0x4   :  { %2820 = vmatprep.subr.bf16.mxu0 %v2819_v3  ;;  %2839 = vmatprep.subr.bf16.mxu1 %v2819_v3  ;;  %v58_v8 = vld [vmem:[%s4111_s0 + $0x100] sm:$0xff]  ;;  %v31_v10 = vld [vmem:[%s4111_s0 + $0x28] sm:$0xff]  ;;  %v32_v12 = vld [vmem:[%s4111_s0 + $0x30] sm:$0xff] }
   0x5   :  { %2822 = vmatpush3.bf16.msra.mxu0 %v2819_v3  ;;  %2840 = vmatpush3.bf16.msra.mxu1 %v2819_v3  ;;  %v61_v13 = vld [vmem:[%s4111_s0 + $0x118] sm:$0xff]  ;;  %v62_v14 = vld [vmem:[%s4111_s0 + $0x120] sm:$0xff]  ;;  %v63_v17 = vld [vmem:[%s4111_s0 + $0x128] sm:$0xff] }
   0x6   :  { %2563 = vmatprep.mubr.msk.f32.mxu1 %vm99_vm0, %v58_v8  ;;  %v33_v15 = vld [vmem:[%s4111_s0 + $0x38] sm:$0xff]  ;;  %v34_v16 = vld [vmem:[%s4111_s0 + $0x40] sm:$0xff]  ;;  %v64_v18 = vld [vmem:[%s4111_s0 + $0x130] sm:$0xff] }
   0x7   :  { %v35_v19 = vld [vmem:[%s4111_s0 + $0x48] sm:$0xff]  ;;  %v36_v20 = vld [vmem:[%s4111_s0 + $0x50] sm:$0xff]  ;;  %v65_v21 = vld [vmem:[%s4111_s0 + $0x138] sm:$0xff] }
   0x8   :  { %2516 = vmatmul.mubr.msk.f32.vlgmr.msra.gmra.mrb[0].mxu0 %vm99_vm0, %v27_v4  ;;  %2564 = vmatmul.mubr.msk.f32.vlgmr.msra.gmra.mrb[0].mxu1 %vm99_vm0, %v59_v9  ;;  %v741_v22 = vld [vmem:[%s4112_s3] sm:$0xff]  ;;  %v742_v23 = vld [vmem:[%s4112_s3 + $0x8] sm:$0xff]  ;;  %v743_v24 = vld [vmem:[%s4112_s3 + $0x10] sm:$0xff] }
   0x9   :  { %2518 = vmatprep.mubr.msk.f32.mxu0 %vm99_vm0, %v28_v5  ;;  %2566 = vmatprep.mubr.msk.f32.mxu1 %vm99_vm0, %v60_v11  ;;  %v66_v25 = vld [vmem:[%s4111_s0 + $0x140] sm:$0xff]  ;;  %v2823_v26 = vpack.c.bf16 %v742_v23, %v741_v22  ;;  %v744_v27 = vld [vmem:[%s4112_s3 + $0x18] sm:$0xff]  ;;  %v67_v31 = vld [vmem:[%s4111_s0 + $0x148] sm:$0xff] }
   0xa   :  { %v37_v28 = vld [vmem:[%s4111_s0 + $0x58] sm:$0xff]  ;;  %v2827_v29 = vpack.c.bf16 %v744_v27, %v743_v24  ;;  %v38_v30 = vld [vmem:[%s4111_s0 + $0x60] sm:$0xff]  ;;  %v68_v32 = vld [vmem:[%s4111_s0 + $0x150] sm:$0xff] }
   0xb   :  { %2824 = vmatprep.subr.bf16.mxu1 %v2823_v26  ;;  %v39_v33 = vld [vmem:[%s4111_s0 + $0x68] sm:$0xff]  ;;  %v40_v34 = vld [vmem:[%s4111_s0 + $0x70] sm:$0xff]  ;;  %v69_v35 = vld [vmem:[%s4111_s0 + $0x158] sm:$0xff] }
   0xc   :  { %2519 = vmatmul.mubr.msk.f32.gmra.mrb[2].mxu0 %vm99_vm0, %v29_v6  ;;  %2567 = vmatmul.mubr.msk.f32.gmra.mrb[2].mxu1 %vm99_vm0, %v61_v13  ;;  %v70_v36 = vld [vmem:[%s4111_s0 + $0x160] sm:$0xff]  ;;  %v41_v37 = vld [vmem:[%s4111_s0 + $0x78] sm:$0xff]  ;;  %v71_v39 = vld [vmem:[%s4111_s0 + $0x168] sm:$0xff] }
   0xd   :  { %2521 = vmatprep.mubr.msk.f32.mxu0 %vm99_vm0, %v30_v7  ;;  %2569 = vmatprep.mubr.msk.f32.mxu1 %vm99_vm0, %v62_v14  ;;  %v42_v38 = vld [vmem:[%s4111_s0 + $0x80] sm:$0xff]  ;;  %v72_v40 = vld [vmem:[%s4111_s0 + $0x170] sm:$0xff]  ;;  %v43_v41 = vld [vmem:[%s4111_s0 + $0x88] sm:$0xff] }
   0xe   :  { %2826 = vmatpush3.bf16.msra.mxu1 %v2823_v26  ;;  %v44_v42 = vld [vmem:[%s4111_s0 + $0x90] sm:$0xff]  ;;  %v73_v43 = vld [vmem:[%s4111_s0 + $0x178] sm:$0xff]  ;;  %v74_v44 = vld [vmem:[%s4111_s0 + $0x180] sm:$0xff] }
   0xf   :  { %2828 = vmatprep.subr.bf16.mxu1 %v2827_v29  ;;  %v45_v45 = vld [vmem:[%s4111_s0 + $0x98] sm:$0xff]  ;;  %v46_v46 = vld [vmem:[%s4111_s0 + $0xa0] sm:$0xff]  ;;  %v75_v47 = vld [vmem:[%s4111_s0 + $0x188] sm:$0xff] }
  0x10   :  { %2522 = vmatmul.mubr.msk.f32.gmra.mrb[4].mxu0 %vm99_vm0, %v31_v10  ;;  %2570 = vmatmul.mubr.msk.f32.gmra.mrb[4].mxu1 %vm99_vm0, %v63_v17  ;;  %v76_v48 = vld [vmem:[%s4111_s0 + $0x190] sm:$0xff]  ;;  %v47_v49 = vld [vmem:[%s4111_s0 + $0xa8] sm:$0xff]  ;;  %v77_v51 = vld [vmem:[%s4111_s0 + $0x198] sm:$0xff] }
  0x11   :  { %2524 = vmatprep.mubr.msk.f32.mxu0 %vm99_vm0, %v32_v12  ;;  %2572 = vmatprep.mubr.msk.f32.mxu1 %vm99_vm0, %v64_v18  ;;  %v48_v50 = vld [vmem:[%s4111_s0 + $0xb0] sm:$0xff]  ;;  %v78_v52 = vld [vmem:[%s4111_s0 + $0x1a0] sm:$0xff]  ;;  %v49_v53 = vld [vmem:[%s4111_s0 + $0xb8] sm:$0xff] }
  0x12   :  { %2830 = vmatpush3.bf16.msra.mxu1 %v2827_v29  ;;  %v50_v54 = vld [vmem:[%s4111_s0 + $0xc0] sm:$0xff]  ;;  %v79_v55 = vld [vmem:[%s4111_s0 + $0x1a8] sm:$0xff]  ;;  %v80_v56 = vld [vmem:[%s4111_s0 + $0x1b0] sm:$0xff] }
  0x13   :  { %v51_v57 = vld [vmem:[%s4111_s0 + $0xc8] sm:$0xff]  ;;  %v52_v58 = vld [vmem:[%s4111_s0 + $0xd0] sm:$0xff]  ;;  %v81_v59 = vld [vmem:[%s4111_s0 + $0x1b8] sm:$0xff] }
  0x14   :  { %2525 = vmatmul.mubr.msk.f32.gmra.mrb[6].mxu0 %vm99_vm0, %v33_v15  ;;  %2573 = vmatmul.mubr.msk.f32.gmra.mrb[6].mxu1 %vm99_vm0, %v65_v21  ;;  %v82_v60 = vld [vmem:[%s4111_s0 + $0x1c0] sm:$0xff]  ;;  %v53_v61 = vld [vmem:[%s4111_s0 + $0xd8] sm:$0xff]  ;;  %v83_v63 = vld [vmem:[%s4111_s0 + $0x1c8] sm:$0xff] }
  0x15   :  { %2527 = vmatprep.mubr.msk.f32.mxu0 %vm99_vm0, %v34_v16  ;;  %2575 = vmatprep.mubr.msk.f32.mxu1 %vm99_vm0, %v66_v25  ;;  %v54_v62 = vld [vmem:[%s4111_s0 + $0xe0] sm:$0xff]  ;;  %v84_v0 = vld [vmem:[%s4111_s0 + $0x1d0] sm:$0xff]  ;;  %v55_v1 = vld [vmem:[%s4111_s0 + $0xe8] sm:$0xff] }
  0x16   :  { %v56_v2 = vld [vmem:[%s4111_s0 + $0xf0] sm:$0xff]  ;;  %v85_v3 = vld [vmem:[%s4111_s0 + $0x1d8] sm:$0xff]  ;;  %v86_v4 = vld [vmem:[%s4111_s0 + $0x1e0] sm:$0xff] }
  0x17   :  { %v57_v5 = vld [vmem:[%s4111_s0 + $0xf8] sm:$0xff]  ;;  %v87_v6 = vld [vmem:[%s4111_s0 + $0x1e8] sm:$0xff]  ;;  %v88_v7 = vld [vmem:[%s4111_s0 + $0x1f0] sm:$0xff] }
  0x18   :  { %2528 = vmatmul.mubr.msk.f32.gmra.mrb[8].mxu0 %vm99_vm0, %v35_v19  ;;  %2576 = vmatmul.mubr.msk.f32.gmra.mrb[8].mxu1 %vm99_vm0, %v67_v31  ;;  %v89_v8 = vld [vmem:[%s4111_s0 + $0x1f8] sm:$0xff]  ;;  %v3222_v9 = vld [vmem:[%s4113_s2] ss:$0 sm:$0xff]  ;;  %v1395_v17 = vld [vmem:[%s4114_s5 + $0x8] sm:$0xff] }
  0x19   :  { %2530 = vmatprep.mubr.msk.f32.mxu0 %vm99_vm0, %v36_v20  ;;  %2578 = vmatprep.mubr.msk.f32.mxu1 %vm99_vm0, %v68_v32  ;;  %v1394_v16 = vld [vmem:[%s4114_s5] sm:$0xff]  ;;  %v1396_v18 = vld [vmem:[%s4114_s5 + $0x10] sm:$0xff]  ;;  %v1397_v23 = vld [vmem:[%s4114_s5 + $0x18] sm:$0xff] }
  0x1a   :  { %v2831_v22 = vpack.c.bf16 %v1395_v17, %v1394_v16  ;;  %v2835_v26 = vpack.c.bf16 %v1397_v23, %v1396_v18 }
  0x1c   :  { %2531 = vmatmul.mubr.msk.f32.gmra.mrb[10].mxu0 %vm99_vm0, %v37_v28  ;;  %2579 = vmatmul.mubr.msk.f32.gmra.mrb[10].mxu1 %vm99_vm0, %v69_v35 }
  0x1d   :  { %2533 = vmatprep.mubr.msk.f32.mxu0 %vm99_vm0, %v38_v30  ;;  %2581 = vmatprep.mubr.msk.f32.mxu1 %vm99_vm0, %v70_v36 }
  0x1e   :  { %2832 = vmatprep.subr.bf16.mxu0 %v2831_v22 }
  0x1f   :  { %2834 = vmatpush3.bf16.msra.mxu0 %v2831_v22 }
  0x20   :  { %2534 = vmatmul.mubr.msk.f32.gmra.mrb[12].mxu0 %vm99_vm0, %v39_v33  ;;  %2582 = vmatmul.mubr.msk.f32.gmra.mrb[12].mxu1 %vm99_vm0, %v71_v39 }
  0x21   :  { %2536 = vmatprep.mubr.msk.f32.mxu0 %vm99_vm0, %v40_v34  ;;  %2584 = vmatprep.mubr.msk.f32.mxu1 %vm99_vm0, %v72_v40 }
  0x22   :  { %2836 = vmatprep.subr.bf16.mxu0 %v2835_v26 }
  0x23   :  { %2838 = vmatpush3.bf16.msra.mxu0 %v2835_v26 }
  0x24   :  { %2537 = vmatmul.mubr.msk.f32.gmra.mrb[14].mxu0 %vm99_vm0, %v41_v37  ;;  %2585 = vmatmul.mubr.msk.f32.gmra.mrb[14].mxu1 %vm99_vm0, %v73_v43 }
  0x25   :  { %2539 = vmatprep.mubr.msk.f32.mxu0 %vm99_vm0, %v42_v38  ;;  %2587 = vmatprep.mubr.msk.f32.mxu1 %vm99_vm0, %v74_v44 }
  0x28   :  { %2540 = vmatmul.mubr.msk.f32.gmra.mrb[16].mxu0 %vm99_vm0, %v43_v41  ;;  %2588 = vmatmul.mubr.msk.f32.gmra.mrb[16].mxu1 %vm99_vm0, %v75_v47 }
  0x29   :  { %2542 = vmatprep.mubr.msk.f32.mxu0 %vm99_vm0, %v44_v42  ;;  %2590 = vmatprep.mubr.msk.f32.mxu1 %vm99_vm0, %v76_v48 }
  0x2c   :  { %2543 = vmatmul.mubr.msk.f32.gmra.mrb[18].mxu0 %vm99_vm0, %v45_v45  ;;  %2591 = vmatmul.mubr.msk.f32.gmra.mrb[18].mxu1 %vm99_vm0, %v77_v51 }
  0x2d   :  { %2545 = vmatprep.mubr.msk.f32.mxu0 %vm99_vm0, %v46_v46  ;;  %2593 = vmatprep.mubr.msk.f32.mxu1 %vm99_vm0, %v78_v52 }
  0x30   :  { %2546 = vmatmul.mubr.msk.f32.gmra.mrb[20].mxu0 %vm99_vm0, %v47_v49  ;;  %2594 = vmatmul.mubr.msk.f32.gmra.mrb[20].mxu1 %vm99_vm0, %v79_v55 }
  0x31   :  { %2548 = vmatprep.mubr.msk.f32.mxu0 %vm99_vm0, %v48_v50  ;;  %2596 = vmatprep.mubr.msk.f32.mxu1 %vm99_vm0, %v80_v56 }
  0x34   :  { %2549 = vmatmul.mubr.msk.f32.gmra.mrb[22].mxu0 %vm99_vm0, %v49_v53  ;;  %2597 = vmatmul.mubr.msk.f32.gmra.mrb[22].mxu1 %vm99_vm0, %v81_v59 }
  0x35   :  { %2551 = vmatprep.mubr.msk.f32.mxu0 %vm99_vm0, %v50_v54  ;;  %2599 = vmatprep.mubr.msk.f32.mxu1 %vm99_vm0, %v82_v60 }
  0x38   :  { %2552 = vmatmul.mubr.msk.f32.gmra.mrb[24].mxu0 %vm99_vm0, %v51_v57  ;;  %2600 = vmatmul.mubr.msk.f32.gmra.mrb[24].mxu1 %vm99_vm0, %v83_v63 }
  0x39   :  { %2554 = vmatprep.mubr.msk.f32.mxu0 %vm99_vm0, %v52_v58  ;;  %2602 = vmatprep.mubr.msk.f32.mxu1 %vm99_vm0, %v84_v0 }
  0x3c   :  { %2555 = vmatmul.mubr.msk.f32.gmra.mrb[26].mxu0 %vm99_vm0, %v53_v61  ;;  %2603 = vmatmul.mubr.msk.f32.gmra.mrb[26].mxu1 %vm99_vm0, %v85_v3 }
  0x3d   :  { %2557 = vmatprep.mubr.msk.f32.mxu0 %vm99_vm0, %v54_v62  ;;  %2605 = vmatprep.mubr.msk.f32.mxu1 %vm99_vm0, %v86_v4 }
  0x40   :  { %2558 = vmatmul.mubr.msk.f32.gmra.mrb[28].mxu0 %vm99_vm0, %v55_v1  ;;  %2606 = vmatmul.mubr.msk.f32.gmra.mrb[28].mxu1 %vm99_vm0, %v87_v6 }
  0x41   :  { %2560 = vmatprep.mubr.msk.f32.mxu0 %vm99_vm0, %v56_v2  ;;  %2608 = vmatprep.mubr.msk.f32.mxu1 %vm99_vm0, %v88_v7 }
  0x44   :  { %2561 = vmatmul.mubr.msk.f32.gmra.mrb[30].mxu0 %vm99_vm0, %v57_v5  ;;  %2609 = vmatmul.mubr.msk.f32.gmra.mrb[30].mxu1 %vm99_vm0, %v89_v8 }
  0xdb   :  { %v2517_v10 = vpop.f32.mrb[0].mxu0  ;;  %v3241_v25 = vpop.f32.mrb[0].mxu1 }
  0xdc   :  { %v364_v11 = vadd.f32 %v2517_v10, %v3222_v9  ;;  %v358_v12 = vpop.f32.mrb[1].mxu0  ;;  %v3244_v27 = vpop.f32.mrb[1].mxu1 }
  0xdd   :  { %v359_v13 = vadd.f32 %v3222_v9, %v358_v12 }
  0xde   :  { %v678_v19 = vmax.f32 %v364_v11, 0.0 }
  0xdf   :  { %v677_v14 = vmax.f32 %v359_v13, 0.0  ;;  %v2520_v15 = vpop.f32.mrb[2].mxu0  ;;  %v3249_v34 = vpop.f32.mrb[2].mxu1 }
  0xe0   :  { %v374_v20 = vadd.f32 %v2520_v15, %v3222_v9  ;;  %v368_v21 = vpop.f32.mrb[3].mxu0  ;;  %v3252_v35 = vpop.f32.mrb[3].mxu1 }
  0xe1   :  { %v369_v24 = vadd.f32 %v3222_v9, %v368_v21  ;;  %2619 = vmatprep.mubr.msk.f32.mxu1 %vm752_vm1, %v677_v14 }
  0xe2   :  { %2620 = vmatmul.mubr.msk.f32.vlgmr.msra.gmra.mrb[32].mxu1 %vm752_vm1, %v678_v19  ;;  %v680_v30 = vmax.f32 %v374_v20, 0.0 }
  0xe3   :  { %v679_v28 = vmax.f32 %v369_v24, 0.0  ;;  %v2523_v29 = vpop.f32.mrb[4].mxu0  ;;  %v3257_v42 = vpop.f32.mrb[4].mxu1 }
  0xe4   :  { %v384_v31 = vadd.f32 %v2523_v29, %v3222_v9  ;;  %v378_v32 = vpop.f32.mrb[5].mxu0  ;;  %v3260_v43 = vpop.f32.mrb[5].mxu1 }
  0xe5   :  { %v379_v33 = vadd.f32 %v3222_v9, %v378_v32  ;;  %2622 = vmatprep.mubr.msk.f32.mxu1 %vm752_vm1, %v679_v28 }
  0xe6   :  { %2623 = vmatmul.mubr.msk.f32.gmra.mrb[34].mxu1 %vm752_vm1, %v680_v30  ;;  %v682_v38 = vmax.f32 %v384_v31, 0.0 }
  0xe7   :  { %v681_v36 = vmax.f32 %v379_v33, 0.0  ;;  %v2526_v37 = vpop.f32.mrb[6].mxu0  ;;  %v3265_v50 = vpop.f32.mrb[6].mxu1 }
  0xe8   :  { %v394_v39 = vadd.f32 %v2526_v37, %v3222_v9  ;;  %v388_v40 = vpop.f32.mrb[7].mxu0  ;;  %v3268_v51 = vpop.f32.mrb[7].mxu1 }
  0xe9   :  { %v389_v41 = vadd.f32 %v3222_v9, %v388_v40  ;;  %2625 = vmatprep.mubr.msk.f32.mxu1 %vm752_vm1, %v681_v36 }
  0xea   :  { %2626 = vmatmul.mubr.msk.f32.gmra.mrb[36].mxu1 %vm752_vm1, %v682_v38  ;;  %v684_v46 = vmax.f32 %v394_v39, 0.0 }
  0xeb   :  { %v683_v44 = vmax.f32 %v389_v41, 0.0  ;;  %v2529_v45 = vpop.f32.mrb[8].mxu0  ;;  %v3273_v58 = vpop.f32.mrb[8].mxu1 }
  0xec   :  { %v404_v47 = vadd.f32 %v2529_v45, %v3222_v9  ;;  %v398_v48 = vpop.f32.mrb[9].mxu0  ;;  %v3276_v59 = vpop.f32.mrb[9].mxu1 }
  0xed   :  { %v399_v49 = vadd.f32 %v3222_v9, %v398_v48  ;;  %2628 = vmatprep.mubr.msk.f32.mxu1 %vm752_vm1, %v683_v44 }
  0xee   :  { %2629 = vmatmul.mubr.msk.f32.gmra.mrb[38].mxu1 %vm752_vm1, %v684_v46  ;;  %v686_v54 = vmax.f32 %v404_v47, 0.0 }
  0xef   :  { %v685_v52 = vmax.f32 %v399_v49, 0.0  ;;  %v2532_v53 = vpop.f32.mrb[10].mxu0  ;;  %v3281_v2 = vpop.f32.mrb[10].mxu1 }
  0xf0   :  { %v414_v55 = vadd.f32 %v2532_v53, %v3222_v9  ;;  %v408_v56 = vpop.f32.mrb[11].mxu0  ;;  %v3284_v3 = vpop.f32.mrb[11].mxu1 }
  0xf1   :  { %v409_v57 = vadd.f32 %v3222_v9, %v408_v56  ;;  %2631 = vmatprep.mubr.msk.f32.mxu1 %vm752_vm1, %v685_v52 }
  0xf2   :  { %2632 = vmatmul.mubr.msk.f32.gmra.mrb[40].mxu1 %vm752_vm1, %v686_v54  ;;  %v688_v62 = vmax.f32 %v414_v55, 0.0 }
  0xf3   :  { %v687_v60 = vmax.f32 %v409_v57, 0.0  ;;  %v2535_v61 = vpop.f32.mrb[12].mxu0  ;;  %v3289_v11 = vpop.f32.mrb[12].mxu1 }
  0xf4   :  { %v424_v63 = vadd.f32 %v2535_v61, %v3222_v9  ;;  %v418_v0 = vpop.f32.mrb[13].mxu0  ;;  %v3292_v12 = vpop.f32.mrb[13].mxu1 }
  0xf5   :  { %v419_v1 = vadd.f32 %v3222_v9, %v418_v0  ;;  %2634 = vmatprep.mubr.msk.f32.mxu1 %vm752_vm1, %v687_v60 }
  0xf6   :  { %2635 = vmatmul.mubr.msk.f32.gmra.mrb[42].mxu1 %vm752_vm1, %v688_v62  ;;  %v690_v6 = vmax.f32 %v424_v63, 0.0 }
  0xf7   :  { %v689_v4 = vmax.f32 %v419_v1, 0.0  ;;  %v2538_v5 = vpop.f32.mrb[14].mxu0  ;;  %v3297_v19 = vpop.f32.mrb[14].mxu1 }
  0xf8   :  { %v434_v7 = vadd.f32 %v2538_v5, %v3222_v9  ;;  %v428_v8 = vpop.f32.mrb[15].mxu0  ;;  %v3300_v20 = vpop.f32.mrb[15].mxu1 }
  0xf9   :  { %v429_v10 = vadd.f32 %v3222_v9, %v428_v8  ;;  %2637 = vmatprep.mubr.msk.f32.mxu1 %vm752_vm1, %v689_v4 }
  0xfa   :  { %2638 = vmatmul.mubr.msk.f32.gmra.mrb[44].mxu1 %vm752_vm1, %v690_v6  ;;  %v692_v15 = vmax.f32 %v434_v7, 0.0 }
  0xfb   :  { %v691_v13 = vmax.f32 %v429_v10, 0.0  ;;  %v2541_v14 = vpop.f32.mrb[16].mxu0  ;;  %v3305_v29 = vpop.f32.mrb[16].mxu1 }
  0xfc   :  { %v444_v16 = vadd.f32 %v2541_v14, %v3222_v9  ;;  %v438_v17 = vpop.f32.mrb[17].mxu0  ;;  %v3308_v30 = vpop.f32.mrb[17].mxu1 }
  0xfd   :  { %v439_v18 = vadd.f32 %v3222_v9, %v438_v17  ;;  %2640 = vmatprep.mubr.msk.f32.mxu1 %vm752_vm1, %v691_v13 }
  0xfe   :  { %2641 = vmatmul.mubr.msk.f32.gmra.mrb[46].mxu1 %vm752_vm1, %v692_v15  ;;  %v694_v23 = vmax.f32 %v444_v16, 0.0 }
  0xff   :  { %v693_v21 = vmax.f32 %v439_v18, 0.0  ;;  %v2544_v22 = vpop.f32.mrb[18].mxu0  ;;  %v3313_v39 = vpop.f32.mrb[18].mxu1 }
 0x100   :  { %v454_v24 = vadd.f32 %v2544_v22, %v3222_v9  ;;  %v448_v26 = vpop.f32.mrb[19].mxu0  ;;  %v3316_v40 = vpop.f32.mrb[19].mxu1 }
 0x101   :  { %v449_v28 = vadd.f32 %v3222_v9, %v448_v26  ;;  %2643 = vmatprep.mubr.msk.f32.mxu1 %vm752_vm1, %v693_v21 }
 0x102   :  { %2644 = vmatmul.mubr.msk.f32.gmra.mrb[48].mxu1 %vm752_vm1, %v694_v23  ;;  %v696_v33 = vmax.f32 %v454_v24, 0.0  ;;  %v519_v24 = vadd.f32 %v3222_v9, %v3244_v27 }
 0x103   :  { %v695_v31 = vmax.f32 %v449_v28, 0.0  ;;  %v2547_v32 = vpop.f32.mrb[20].mxu0  ;;  %v3321_v49 = vpop.f32.mrb[20].mxu1 }
 0x104   :  { %v464_v36 = vadd.f32 %v2547_v32, %v3222_v9  ;;  %v458_v37 = vpop.f32.mrb[21].mxu0  ;;  %v3324_v52 = vpop.f32.mrb[21].mxu1 }
 0x105   :  { %v459_v38 = vadd.f32 %v3222_v9, %v458_v37  ;;  %2646 = vmatprep.mubr.msk.f32.mxu1 %vm752_vm1, %v695_v31 }
 0x106   :  { %2647 = vmatmul.mubr.msk.f32.gmra.mrb[50].mxu1 %vm752_vm1, %v696_v33  ;;  %v698_v45 = vmax.f32 %v464_v36, 0.0 }
 0x107   :  { %v697_v41 = vmax.f32 %v459_v38, 0.0  ;;  %v2550_v44 = vpop.f32.mrb[22].mxu0  ;;  %v3329_v61 = vpop.f32.mrb[22].mxu1  ;;  %v709_v38 = vmax.f32 %v519_v24, 0.0 }
 0x108   :  { %v474_v46 = vadd.f32 %v2550_v44, %v3222_v9  ;;  %v468_v47 = vpop.f32.mrb[23].mxu0  ;;  %v3332_v62 = vpop.f32.mrb[23].mxu1  ;;  %v524_v44 = vadd.f32 %v3241_v25, %v3222_v9 }
 0x109   :  { %v469_v48 = vadd.f32 %v3222_v9, %v468_v47  ;;  %2649 = vmatprep.mubr.msk.f32.mxu1 %vm752_vm1, %v697_v41  ;;  %v529_v41 = vadd.f32 %v3222_v9, %v3252_v35  ;;  %v534_v35 = vadd.f32 %v3249_v34, %v3222_v9  ;;  %v559_v34 = vadd.f32 %v3222_v9, %v3276_v59 }
 0x10a   :  { %2650 = vmatmul.mubr.msk.f32.gmra.mrb[52].mxu1 %vm752_vm1, %v698_v45  ;;  %v700_v55 = vmax.f32 %v474_v46, 0.0 }
 0x10b   :  { %v699_v53 = vmax.f32 %v469_v48, 0.0  ;;  %v2553_v54 = vpop.f32.mrb[24].mxu0  ;;  %v3337_v7 = vpop.f32.mrb[24].mxu1  ;;  %v711_v47 = vmax.f32 %v529_v41, 0.0  ;;  %v539_v48 = vadd.f32 %v3222_v9, %v3260_v43 }
 0x10c   :  { %v484_v56 = vadd.f32 %v2553_v54, %v3222_v9  ;;  %v478_v57 = vpop.f32.mrb[25].mxu0  ;;  %v3340_v8 = vpop.f32.mrb[25].mxu1  ;;  %v549_v54 = vadd.f32 %v3222_v9, %v3268_v51 }
 0x10d   :  { %v479_v60 = vadd.f32 %v3222_v9, %v478_v57  ;;  %2652 = vmatprep.mubr.msk.f32.mxu1 %vm752_vm1, %v699_v53  ;;  %v710_v53 = vmax.f32 %v524_v44, 0.0  ;;  %v713_v25 = vmax.f32 %v539_v48, 0.0 }
 0x10e   :  { %2653 = vmatmul.mubr.msk.f32.gmra.mrb[54].mxu1 %vm752_vm1, %v700_v55  ;;  %v702_v1 = vmax.f32 %v484_v56, 0.0  ;;  %v712_v55 = vmax.f32 %v534_v35, 0.0  ;;  %v544_v56 = vadd.f32 %v3257_v42, %v3222_v9  ;;  %v715_v57 = vmax.f32 %v549_v54, 0.0 }
 0x10f   :  { %v701_v63 = vmax.f32 %v479_v60, 0.0  ;;  %v2556_v0 = vpop.f32.mrb[26].mxu0  ;;  %v3345_v18 = vpop.f32.mrb[26].mxu1  ;;  %v554_v60 = vadd.f32 %v3265_v50, %v3222_v9  ;;  %v569_v42 = vadd.f32 %v3222_v9, %v3284_v3  ;;  %v579_v50 = vadd.f32 %v3222_v9, %v3292_v12 }
 0x110   :  { %v494_v4 = vadd.f32 %v2556_v0, %v3222_v9  ;;  %v488_v5 = vpop.f32.mrb[27].mxu0  ;;  %v3348_v21 = vpop.f32.mrb[27].mxu1  ;;  %v714_v43 = vmax.f32 %v544_v56, 0.0  ;;  %v564_v0 = vadd.f32 %v3273_v58, %v3222_v9  ;;  %v589_v58 = vadd.f32 %v3222_v9, %v3300_v20 }
 0x111   :  { %v489_v6 = vadd.f32 %v3222_v9, %v488_v5  ;;  %2655 = vmatprep.mubr.msk.f32.mxu1 %vm752_vm1, %v701_v63  ;;  %v717_v63 = vmax.f32 %v559_v34, 0.0  ;;  %v716_v51 = vmax.f32 %v554_v60, 0.0  ;;  %v721_v5 = vmax.f32 %v579_v50, 0.0 }
 0x112   :  { %2656 = vmatmul.mubr.msk.f32.gmra.mrb[56].mxu1 %vm752_vm1, %v702_v1  ;;  %v704_v14 = vmax.f32 %v494_v4, 0.0  ;;  %v719_v1 = vmax.f32 %v569_v42, 0.0  ;;  %v718_v59 = vmax.f32 %v564_v0, 0.0  ;;  %v574_v4 = vadd.f32 %v3281_v2, %v3222_v9 }
 0x113   :  { %v703_v10 = vmax.f32 %v489_v6, 0.0  ;;  %v2559_v13 = vpop.f32.mrb[28].mxu0  ;;  %v3355_v33 = vpop.f32.mrb[28].mxu1  ;;  %v584_v6 = vadd.f32 %v3289_v11, %v3222_v9  ;;  %v599_v2 = vadd.f32 %v3222_v9, %v3308_v30  ;;  %v609_v11 = vadd.f32 %v3222_v9, %v3316_v40 }
 0x114   :  { %v504_v15 = vadd.f32 %v2559_v13, %v3222_v9  ;;  %v498_v16 = vpop.f32.mrb[29].mxu0  ;;  %v3358_v36 = vpop.f32.mrb[29].mxu1  ;;  %v720_v3 = vmax.f32 %v574_v4, 0.0  ;;  %v594_v13 = vadd.f32 %v3297_v19, %v3222_v9  ;;  %v619_v19 = vadd.f32 %v3222_v9, %v3324_v52 }
 0x115   :  { %v499_v17 = vadd.f32 %v3222_v9, %v498_v16  ;;  %2658 = vmatprep.mubr.msk.f32.mxu1 %vm752_vm1, %v703_v10  ;;  %v723_v10 = vmax.f32 %v589_v58, 0.0  ;;  %v722_v12 = vmax.f32 %v584_v6, 0.0  ;;  %v727_v16 = vmax.f32 %v609_v11, 0.0 }
 0x116   :  { %2659 = vmatmul.mubr.msk.f32.gmra.mrb[58].mxu1 %vm752_vm1, %v704_v14  ;;  %v706_v26 = vmax.f32 %v504_v15, 0.0  ;;  %v725_v14 = vmax.f32 %v599_v2, 0.0  ;;  %v724_v20 = vmax.f32 %v594_v13, 0.0  ;;  %v604_v15 = vadd.f32 %v3305_v29, %v3222_v9 }
 0x117   :  { %v705_v22 = vmax.f32 %v499_v17, 0.0  ;;  %v2562_v23 = vpop.f32.mrb[30].mxu0  ;;  %v3365_v45 = vpop.f32.mrb[30].mxu1  ;;  %v614_v17 = vadd.f32 %v3313_v39, %v3222_v9  ;;  %v629_v29 = vadd.f32 %v3222_v9, %v3332_v62  ;;  %v639_v39 = vadd.f32 %v3222_v9, %v3340_v8 }
 0x118   :  { %v514_v28 = vadd.f32 %v2562_v23, %v3222_v9  ;;  %v508_v31 = vpop.f32.mrb[31].mxu0  ;;  %v3368_v46 = vpop.f32.mrb[31].mxu1  ;;  %v726_v30 = vmax.f32 %v604_v15, 0.0  ;;  %v624_v23 = vadd.f32 %v3321_v49, %v3222_v9  ;;  %v649_v49 = vadd.f32 %v3222_v9, %v3348_v21 }
 0x119   :  { %v509_v32 = vadd.f32 %v3222_v9, %v508_v31  ;;  %2661 = vmatprep.mubr.msk.f32.mxu1 %vm752_vm1, %v705_v22  ;;  %v729_v22 = vmax.f32 %v619_v19, 0.0  ;;  %v728_v40 = vmax.f32 %v614_v17, 0.0  ;;  %v731_v24 = vmax.f32 %v629_v29, 0.0 }
 0x11a   :  { %2662 = vmatmul.mubr.msk.f32.gmra.mrb[60].mxu1 %vm752_vm1, %v706_v26  ;;  %v708_v27 = vmax.f32 %v514_v28, 0.0  ;;  %v730_v52 = vmax.f32 %v624_v23, 0.0  ;;  %v634_v26 = vadd.f32 %v3329_v61, %v3222_v9  ;;  %v733_v28 = vmax.f32 %v639_v39, 0.0 }
 0x11b   :  { %v707_v37 = vmax.f32 %v509_v32, 0.0  ;;  %v644_v31 = vadd.f32 %v3337_v7, %v3222_v9  ;;  %v735_v32 = vmax.f32 %v649_v49, 0.0  ;;  %v659_v61 = vadd.f32 %v3222_v9, %v3358_v36 }
 0x11c   :  { %v732_v62 = vmax.f32 %v634_v26, 0.0  ;;  %v669_v7 = vadd.f32 %v3222_v9, %v3368_v46  ;;  %v664_v41 = vadd.f32 %v3355_v33, %v3222_v9  ;;  %v3463_v33 = vld [vmem:[%s4115_s4] ss:$0 sm:$0xff] }
 0x11d   :  { %2664 = vmatprep.mubr.msk.f32.mxu1 %vm752_vm1, %v707_v37  ;;  %v734_v8 = vmax.f32 %v644_v31, 0.0  ;;  %v654_v37 = vadd.f32 %v3345_v18, %v3222_v9  ;;  %v674_v18 = vadd.f32 %v3365_v45, %v3222_v9 }
 0x11e   :  { %2665 = vmatmul.mubr.msk.f32.gmra.mrb[62].mxu1 %vm752_vm1, %v708_v27  ;;  %v739_v27 = vmax.f32 %v669_v7, 0.0  ;;  %v738_v36 = vmax.f32 %v664_v41, 0.0 }
 0x11f   :  { %2667 = vmatprep.mubr.msk.f32.mxu1 %vm752_vm1, %v709_v38  ;;  %v737_v38 = vmax.f32 %v659_v61, 0.0  ;;  %v736_v21 = vmax.f32 %v654_v37, 0.0  ;;  %v740_v44 = vmax.f32 %v674_v18, 0.0 }
 0x122   :  { %2668 = vmatmul.mubr.msk.f32.gmra.mrb[64].mxu1 %vm752_vm1, %v710_v53 }
 0x123   :  { %2670 = vmatprep.mubr.msk.f32.mxu1 %vm752_vm1, %v711_v47 }
 0x126   :  { %2671 = vmatmul.mubr.msk.f32.gmra.mrb[66].mxu1 %vm752_vm1, %v712_v55 }
 0x127   :  { %2673 = vmatprep.mubr.msk.f32.mxu1 %vm752_vm1, %v713_v25 }
 0x12a   :  { %2674 = vmatmul.mubr.msk.f32.gmra.mrb[68].mxu1 %vm752_vm1, %v714_v43 }
 0x12b   :  { %2676 = vmatprep.mubr.msk.f32.mxu1 %vm752_vm1, %v715_v57 }
 0x12e   :  { %2677 = vmatmul.mubr.msk.f32.gmra.mrb[70].mxu1 %vm752_vm1, %v716_v51 }
 0x12f   :  { %2679 = vmatprep.mubr.msk.f32.mxu1 %vm752_vm1, %v717_v63 }
 0x132   :  { %2680 = vmatmul.mubr.msk.f32.gmra.mrb[72].mxu1 %vm752_vm1, %v718_v59 }
 0x133   :  { %2682 = vmatprep.mubr.msk.f32.mxu1 %vm752_vm1, %v719_v1 }
 0x136   :  { %2683 = vmatmul.mubr.msk.f32.gmra.mrb[74].mxu1 %vm752_vm1, %v720_v3 }
 0x137   :  { %2685 = vmatprep.mubr.msk.f32.mxu1 %vm752_vm1, %v721_v5 }
 0x13a   :  { %2686 = vmatmul.mubr.msk.f32.gmra.mrb[76].mxu1 %vm752_vm1, %v722_v12 }
 0x13b   :  { %2688 = vmatprep.mubr.msk.f32.mxu1 %vm752_vm1, %v723_v10 }
 0x13e   :  { %2689 = vmatmul.mubr.msk.f32.gmra.mrb[78].mxu1 %vm752_vm1, %v724_v20 }
 0x13f   :  { %2691 = vmatprep.mubr.msk.f32.mxu1 %vm752_vm1, %v725_v14 }
 0x142   :  { %2692 = vmatmul.mubr.msk.f32.gmra.mrb[80].mxu1 %vm752_vm1, %v726_v30 }
 0x143   :  { %2694 = vmatprep.mubr.msk.f32.mxu1 %vm752_vm1, %v727_v16 }
 0x146   :  { %2695 = vmatmul.mubr.msk.f32.gmra.mrb[82].mxu1 %vm752_vm1, %v728_v40 }
 0x147   :  { %2697 = vmatprep.mubr.msk.f32.mxu1 %vm752_vm1, %v729_v22 }
 0x14a   :  { %2698 = vmatmul.mubr.msk.f32.gmra.mrb[84].mxu1 %vm752_vm1, %v730_v52 }
 0x14b   :  { %2700 = vmatprep.mubr.msk.f32.mxu1 %vm752_vm1, %v731_v24 }
 0x14e   :  { %2701 = vmatmul.mubr.msk.f32.gmra.mrb[86].mxu1 %vm752_vm1, %v732_v62 }
 0x14f   :  { %2703 = vmatprep.mubr.msk.f32.mxu1 %vm752_vm1, %v733_v28 }
 0x152   :  { %2704 = vmatmul.mubr.msk.f32.gmra.mrb[88].mxu1 %vm752_vm1, %v734_v8 }
 0x153   :  { %2706 = vmatprep.mubr.msk.f32.mxu1 %vm752_vm1, %v735_v32 }
 0x156   :  { %2707 = vmatmul.mubr.msk.f32.gmra.mrb[90].mxu1 %vm752_vm1, %v736_v21 }
 0x157   :  { %2709 = vmatprep.mubr.msk.f32.mxu1 %vm752_vm1, %v737_v38 }
 0x15a   :  { %2710 = vmatmul.mubr.msk.f32.gmra.mrb[92].mxu1 %vm752_vm1, %v738_v36 }
 0x15b   :  { %2712 = vmatprep.mubr.msk.f32.mxu1 %vm752_vm1, %v739_v27 }
 0x15e   :  { %2713 = vmatmul.mubr.msk.f32.gmra.mrb[94].mxu1 %vm752_vm1, %v740_v44 }
 0x1b5   :  { %v2621_v46 = vpop.f32.mrb[32].mxu1 }
 0x1b6   :  { %v1017_v47 = vadd.f32 %v2621_v46, %v3463_v33  ;;  %v1011_v48 = vpop.f32.mrb[33].mxu1 }
 0x1b7   :  { %v1012_v53 = vadd.f32 %v3463_v33, %v1011_v48 }
 0x1b8   :  { %v1331_v45 = vmax.f32 %v1017_v47, 0.0 }
 0x1b9   :  { %v1330_v35 = vmax.f32 %v1012_v53, 0.0  ;;  %v2624_v9 = vpop.f32.mrb[34].mxu1 }
 0x1ba   :  { %v1027_v25 = vadd.f32 %v2624_v9, %v3463_v33  ;;  %v1021_v54 = vpop.f32.mrb[35].mxu1 }
 0x1bb   :  { %v1022_v55 = vadd.f32 %v3463_v33, %v1021_v54  ;;  %2723 = vmatprep.mubr.msk.f32.mxu0 %vm752_vm1, %v1330_v35 }
 0x1bc   :  { %2724 = vmatmul.mubr.msk.f32.vlgmr.msra.gmra.mrb[32].mxu0 %vm752_vm1, %v1331_v45  ;;  %v1333_v34 = vmax.f32 %v1027_v25, 0.0 }
 0x1bd   :  { %v1332_v56 = vmax.f32 %v1022_v55, 0.0  ;;  %v2627_v57 = vpop.f32.mrb[36].mxu1 }
 0x1be   :  { %v1037_v43 = vadd.f32 %v2627_v57, %v3463_v33  ;;  %v1031_v60 = vpop.f32.mrb[37].mxu1 }
 0x1bf   :  { %v1032_v63 = vadd.f32 %v3463_v33, %v1031_v60  ;;  %2726 = vmatprep.mubr.msk.f32.mxu0 %vm752_vm1, %v1332_v56 }
 0x1c0   :  { %2727 = vmatmul.mubr.msk.f32.gmra.mrb[34].mxu0 %vm752_vm1, %v1333_v34  ;;  %v1335_v0 = vmax.f32 %v1037_v43, 0.0 }
 0x1c1   :  { %v1334_v42 = vmax.f32 %v1032_v63, 0.0  ;;  %v2630_v51 = vpop.f32.mrb[38].mxu1 }
 0x1c2   :  { %v1047_v1 = vadd.f32 %v2630_v51, %v3463_v33  ;;  %v1041_v50 = vpop.f32.mrb[39].mxu1 }
 0x1c3   :  { %v1042_v59 = vadd.f32 %v3463_v33, %v1041_v50  ;;  %2729 = vmatprep.mubr.msk.f32.mxu0 %vm752_vm1, %v1334_v42 }
 0x1c4   :  { %2730 = vmatmul.mubr.msk.f32.gmra.mrb[36].mxu0 %vm752_vm1, %v1335_v0  ;;  %v1337_v58 = vmax.f32 %v1047_v1, 0.0 }
 0x1c5   :  { %v1336_v4 = vmax.f32 %v1042_v59, 0.0  ;;  %v2633_v5 = vpop.f32.mrb[40].mxu1 }
 0x1c6   :  { %v1057_v3 = vadd.f32 %v2633_v5, %v3463_v33  ;;  %v1051_v6 = vpop.f32.mrb[41].mxu1 }
 0x1c7   :  { %v1052_v10 = vadd.f32 %v3463_v33, %v1051_v6  ;;  %2732 = vmatprep.mubr.msk.f32.mxu0 %vm752_vm1, %v1336_v4 }
 0x1c8   :  { %2733 = vmatmul.mubr.msk.f32.gmra.mrb[38].mxu0 %vm752_vm1, %v1337_v58  ;;  %v1339_v13 = vmax.f32 %v1057_v3, 0.0 }
 0x1c9   :  { %v1338_v2 = vmax.f32 %v1052_v10, 0.0  ;;  %v2636_v12 = vpop.f32.mrb[42].mxu1 }
 0x1ca   :  { %v1067_v14 = vadd.f32 %v2636_v12, %v3463_v33  ;;  %v1061_v11 = vpop.f32.mrb[43].mxu1 }
 0x1cb   :  { %v1062_v20 = vadd.f32 %v3463_v33, %v1061_v11  ;;  %2735 = vmatprep.mubr.msk.f32.mxu0 %vm752_vm1, %v1338_v2 }
 0x1cc   :  { %2736 = vmatmul.mubr.msk.f32.gmra.mrb[40].mxu0 %vm752_vm1, %v1339_v13  ;;  %v1341_v19 = vmax.f32 %v1067_v14, 0.0 }
 0x1cd   :  { %v1340_v15 = vmax.f32 %v1062_v20, 0.0  ;;  %v2639_v16 = vpop.f32.mrb[44].mxu1 }
 0x1ce   :  { %v1077_v30 = vadd.f32 %v2639_v16, %v3463_v33  ;;  %v1071_v17 = vpop.f32.mrb[45].mxu1 }
 0x1cf   :  { %v1072_v22 = vadd.f32 %v3463_v33, %v1071_v17  ;;  %2738 = vmatprep.mubr.msk.f32.mxu0 %vm752_vm1, %v1340_v15 }
 0x1d0   :  { %2739 = vmatmul.mubr.msk.f32.gmra.mrb[42].mxu0 %vm752_vm1, %v1341_v19  ;;  %v1343_v23 = vmax.f32 %v1077_v30, 0.0 }
 0x1d1   :  { %v1342_v29 = vmax.f32 %v1072_v22, 0.0  ;;  %v2642_v40 = vpop.f32.mrb[46].mxu1 }
 0x1d2   :  { %v1087_v24 = vadd.f32 %v2642_v40, %v3463_v33  ;;  %v1081_v39 = vpop.f32.mrb[47].mxu1 }
 0x1d3   :  { %v1082_v52 = vadd.f32 %v3463_v33, %v1081_v39  ;;  %2741 = vmatprep.mubr.msk.f32.mxu0 %vm752_vm1, %v1342_v29 }
 0x1d4   :  { %2742 = vmatmul.mubr.msk.f32.gmra.mrb[44].mxu0 %vm752_vm1, %v1343_v23  ;;  %v1345_v49 = vmax.f32 %v1087_v24, 0.0 }
 0x1d5   :  { %v1344_v26 = vmax.f32 %v1082_v52, 0.0  ;;  %v2645_v28 = vpop.f32.mrb[48].mxu1 }
 0x1d6   :  { %v1097_v62 = vadd.f32 %v2645_v28, %v3463_v33  ;;  %v1091_v31 = vpop.f32.mrb[49].mxu1 }
 0x1d7   :  { %v1092_v32 = vadd.f32 %v3463_v33, %v1091_v31  ;;  %2744 = vmatprep.mubr.msk.f32.mxu0 %vm752_vm1, %v1344_v26 }
 0x1d8   :  { %2745 = vmatmul.mubr.msk.f32.gmra.mrb[46].mxu0 %vm752_vm1, %v1345_v49  ;;  %v1347_v37 = vmax.f32 %v1097_v62, 0.0 }
 0x1d9   :  { %v1346_v61 = vmax.f32 %v1092_v32, 0.0  ;;  %v2648_v8 = vpop.f32.mrb[50].mxu1 }
 0x1da   :  { %v1107_v38 = vadd.f32 %v2648_v8, %v3463_v33  ;;  %v1101_v7 = vpop.f32.mrb[51].mxu1 }
 0x1db   :  { %v1102_v21 = vadd.f32 %v3463_v33, %v1101_v7  ;;  %2747 = vmatprep.mubr.msk.f32.mxu0 %vm752_vm1, %v1346_v61 }
 0x1dc   :  { %2748 = vmatmul.mubr.msk.f32.gmra.mrb[48].mxu0 %vm752_vm1, %v1347_v37  ;;  %v1349_v36 = vmax.f32 %v1107_v38, 0.0 }
 0x1dd   :  { %v1348_v41 = vmax.f32 %v1102_v21, 0.0  ;;  %v2651_v27 = vpop.f32.mrb[52].mxu1 }
 0x1de   :  { %v1117_v18 = vadd.f32 %v2651_v27, %v3463_v33  ;;  %v1111_v44 = vpop.f32.mrb[53].mxu1 }
 0x1df   :  { %v1112_v46 = vadd.f32 %v3463_v33, %v1111_v44  ;;  %2750 = vmatprep.mubr.msk.f32.mxu0 %vm752_vm1, %v1348_v41 }
 0x1e0   :  { %2751 = vmatmul.mubr.msk.f32.gmra.mrb[50].mxu0 %vm752_vm1, %v1349_v36  ;;  %v1351_v53 = vmax.f32 %v1117_v18, 0.0 }
 0x1e1   :  { %v1350_v47 = vmax.f32 %v1112_v46, 0.0  ;;  %v2654_v48 = vpop.f32.mrb[54].mxu1 }
 0x1e2   :  { %v1127_v35 = vadd.f32 %v2654_v48, %v3463_v33  ;;  %v1121_v9 = vpop.f32.mrb[55].mxu1 }
 0x1e3   :  { %v1122_v45 = vadd.f32 %v3463_v33, %v1121_v9  ;;  %2753 = vmatprep.mubr.msk.f32.mxu0 %vm752_vm1, %v1350_v47 }
 0x1e4   :  { %2754 = vmatmul.mubr.msk.f32.gmra.mrb[52].mxu0 %vm752_vm1, %v1351_v53  ;;  %v1353_v55 = vmax.f32 %v1127_v35, 0.0 }
 0x1e5   :  { %v1352_v25 = vmax.f32 %v1122_v45, 0.0  ;;  %v2657_v54 = vpop.f32.mrb[56].mxu1 }
 0x1e6   :  { %v1137_v56 = vadd.f32 %v2657_v54, %v3463_v33  ;;  %v1131_v57 = vpop.f32.mrb[57].mxu1 }
 0x1e7   :  { %v1132_v34 = vadd.f32 %v3463_v33, %v1131_v57  ;;  %2756 = vmatprep.mubr.msk.f32.mxu0 %vm752_vm1, %v1352_v25 }
 0x1e8   :  { %2757 = vmatmul.mubr.msk.f32.gmra.mrb[54].mxu0 %vm752_vm1, %v1353_v55  ;;  %v1355_v63 = vmax.f32 %v1137_v56, 0.0 }
 0x1e9   :  { %v1354_v43 = vmax.f32 %v1132_v34, 0.0  ;;  %v2660_v60 = vpop.f32.mrb[58].mxu1 }
 0x1ea   :  { %v1147_v42 = vadd.f32 %v2660_v60, %v3463_v33  ;;  %v1141_v51 = vpop.f32.mrb[59].mxu1 }
 0x1eb   :  { %v1142_v0 = vadd.f32 %v3463_v33, %v1141_v51  ;;  %2759 = vmatprep.mubr.msk.f32.mxu0 %vm752_vm1, %v1354_v43 }
 0x1ec   :  { %2760 = vmatmul.mubr.msk.f32.gmra.mrb[56].mxu0 %vm752_vm1, %v1355_v63  ;;  %v1357_v59 = vmax.f32 %v1147_v42, 0.0 }
 0x1ed   :  { %v1356_v1 = vmax.f32 %v1142_v0, 0.0  ;;  %v2663_v50 = vpop.f32.mrb[60].mxu1 }
 0x1ee   :  { %v1157_v4 = vadd.f32 %v2663_v50, %v3463_v33  ;;  %v1151_v5 = vpop.f32.mrb[61].mxu1 }
 0x1ef   :  { %v1152_v58 = vadd.f32 %v3463_v33, %v1151_v5  ;;  %2762 = vmatprep.mubr.msk.f32.mxu0 %vm752_vm1, %v1356_v1 }
 0x1f0   :  { %2763 = vmatmul.mubr.msk.f32.gmra.mrb[58].mxu0 %vm752_vm1, %v1357_v59  ;;  %v1359_v10 = vmax.f32 %v1157_v4, 0.0 }
 0x1f1   :  { %v1358_v3 = vmax.f32 %v1152_v58, 0.0  ;;  %v2666_v6 = vpop.f32.mrb[62].mxu1 }
 0x1f2   :  { %v1167_v2 = vadd.f32 %v2666_v6, %v3463_v33  ;;  %v1161_v12 = vpop.f32.mrb[63].mxu1 }
 0x1f3   :  { %v1162_v13 = vadd.f32 %v3463_v33, %v1161_v12  ;;  %2765 = vmatprep.mubr.msk.f32.mxu0 %vm752_vm1, %v1358_v3 }
 0x1f4   :  { %2766 = vmatmul.mubr.msk.f32.gmra.mrb[60].mxu0 %vm752_vm1, %v1359_v10  ;;  %v1361_v20 = vmax.f32 %v1167_v2, 0.0 }
 0x1f5   :  { %v1360_v14 = vmax.f32 %v1162_v13, 0.0  ;;  %v2669_v11 = vpop.f32.mrb[64].mxu1 }
 0x1f6   :  { %v1177_v15 = vadd.f32 %v2669_v11, %v3463_v33  ;;  %v1171_v16 = vpop.f32.mrb[65].mxu1 }
 0x1f7   :  { %v1172_v19 = vadd.f32 %v3463_v33, %v1171_v16  ;;  %2768 = vmatprep.mubr.msk.f32.mxu0 %vm752_vm1, %v1360_v14 }
 0x1f8   :  { %2769 = vmatmul.mubr.msk.f32.gmra.mrb[62].mxu0 %vm752_vm1, %v1361_v20  ;;  %v1363_v22 = vmax.f32 %v1177_v15, 0.0 }
 0x1f9   :  { %v1362_v30 = vmax.f32 %v1172_v19, 0.0  ;;  %v2672_v17 = vpop.f32.mrb[66].mxu1 }
 0x1fa   :  { %v1187_v29 = vadd.f32 %v2672_v17, %v3463_v33  ;;  %v1181_v40 = vpop.f32.mrb[67].mxu1 }
 0x1fb   :  { %v1182_v23 = vadd.f32 %v3463_v33, %v1181_v40  ;;  %2771 = vmatprep.mubr.msk.f32.mxu0 %vm752_vm1, %v1362_v30 }
 0x1fc   :  { %2772 = vmatmul.mubr.msk.f32.gmra.mrb[64].mxu0 %vm752_vm1, %v1363_v22  ;;  %v1365_v52 = vmax.f32 %v1187_v29, 0.0 }
 0x1fd   :  { %v1364_v24 = vmax.f32 %v1182_v23, 0.0  ;;  %v2675_v39 = vpop.f32.mrb[68].mxu1 }
 0x1fe   :  { %v1197_v26 = vadd.f32 %v2675_v39, %v3463_v33  ;;  %v1191_v28 = vpop.f32.mrb[69].mxu1 }
 0x1ff   :  { %v1192_v49 = vadd.f32 %v3463_v33, %v1191_v28  ;;  %2774 = vmatprep.mubr.msk.f32.mxu0 %vm752_vm1, %v1364_v24 }
 0x200   :  { %2775 = vmatmul.mubr.msk.f32.gmra.mrb[66].mxu0 %vm752_vm1, %v1365_v52  ;;  %v1367_v32 = vmax.f32 %v1197_v26, 0.0 }
 0x201   :  { %v1366_v62 = vmax.f32 %v1192_v49, 0.0  ;;  %v2678_v31 = vpop.f32.mrb[70].mxu1 }
 0x202   :  { %v1207_v61 = vadd.f32 %v2678_v31, %v3463_v33  ;;  %v1201_v8 = vpop.f32.mrb[71].mxu1 }
 0x203   :  { %v1202_v37 = vadd.f32 %v3463_v33, %v1201_v8  ;;  %2777 = vmatprep.mubr.msk.f32.mxu0 %vm752_vm1, %v1366_v62 }
 0x204   :  { %2778 = vmatmul.mubr.msk.f32.gmra.mrb[68].mxu0 %vm752_vm1, %v1367_v32  ;;  %v1369_v21 = vmax.f32 %v1207_v61, 0.0 }
 0x205   :  { %v1368_v38 = vmax.f32 %v1202_v37, 0.0  ;;  %v2681_v7 = vpop.f32.mrb[72].mxu1 }
 0x206   :  { %v1217_v41 = vadd.f32 %v2681_v7, %v3463_v33  ;;  %v1211_v27 = vpop.f32.mrb[73].mxu1 }
 0x207   :  { %v1212_v36 = vadd.f32 %v3463_v33, %v1211_v27  ;;  %2780 = vmatprep.mubr.msk.f32.mxu0 %vm752_vm1, %v1368_v38 }
 0x208   :  { %2781 = vmatmul.mubr.msk.f32.gmra.mrb[70].mxu0 %vm752_vm1, %v1369_v21  ;;  %v1371_v46 = vmax.f32 %v1217_v41, 0.0 }
 0x209   :  { %v1370_v18 = vmax.f32 %v1212_v36, 0.0  ;;  %v2684_v44 = vpop.f32.mrb[74].mxu1 }
 0x20a   :  { %v1227_v47 = vadd.f32 %v2684_v44, %v3463_v33  ;;  %v1221_v48 = vpop.f32.mrb[75].mxu1 }
 0x20b   :  { %v1222_v53 = vadd.f32 %v3463_v33, %v1221_v48  ;;  %2783 = vmatprep.mubr.msk.f32.mxu0 %vm752_vm1, %v1370_v18 }
 0x20c   :  { %2784 = vmatmul.mubr.msk.f32.gmra.mrb[72].mxu0 %vm752_vm1, %v1371_v46  ;;  %v1373_v45 = vmax.f32 %v1227_v47, 0.0 }
 0x20d   :  { %v1372_v35 = vmax.f32 %v1222_v53, 0.0  ;;  %v2687_v9 = vpop.f32.mrb[76].mxu1  ;;  %v3596_v53 = vld [vmem:[%s4116_s6] ss:$0 sm:$0xff] }
 0x20e   :  { %v1237_v25 = vadd.f32 %v2687_v9, %v3463_v33  ;;  %v1231_v54 = vpop.f32.mrb[77].mxu1 }
 0x20f   :  { %v1232_v55 = vadd.f32 %v3463_v33, %v1231_v54  ;;  %2786 = vmatprep.mubr.msk.f32.mxu0 %vm752_vm1, %v1372_v35 }
 0x210   :  { %2787 = vmatmul.mubr.msk.f32.gmra.mrb[74].mxu0 %vm752_vm1, %v1373_v45  ;;  %v1375_v34 = vmax.f32 %v1237_v25, 0.0  ;;  %v2841_v25 = vld [vmem:[%s4111_s0 + $0x8] sm:$0xff] }
 0x211   :  { %v1374_v56 = vmax.f32 %v1232_v55, 0.0  ;;  %v2690_v57 = vpop.f32.mrb[78].mxu1  ;;  %v2842_v55 = vld [vmem:[%s4111_s0] sm:$0xff] }
 0x212   :  { %v1247_v43 = vadd.f32 %v2690_v57, %v3463_v33  ;;  %v1241_v60 = vpop.f32.mrb[79].mxu1 }
 0x213   :  { %v1242_v63 = vadd.f32 %v3463_v33, %v1241_v60  ;;  %2789 = vmatprep.mubr.msk.f32.mxu0 %vm752_vm1, %v1374_v56 }
 0x214   :  { %2790 = vmatmul.mubr.msk.f32.gmra.mrb[76].mxu0 %vm752_vm1, %v1375_v34  ;;  %v1377_v0 = vmax.f32 %v1247_v43, 0.0 }
 0x215   :  { %v1376_v42 = vmax.f32 %v1242_v63, 0.0  ;;  %v2693_v51 = vpop.f32.mrb[80].mxu1  ;;  %v2843_v63 = vld [vmem:[%s4111_s0 + $0x18] sm:$0xff] }
 0x216   :  { %v1257_v1 = vadd.f32 %v2693_v51, %v3463_v33  ;;  %v1251_v50 = vpop.f32.mrb[81].mxu1  ;;  %v2844_v51 = vld [vmem:[%s4111_s0 + $0x10] sm:$0xff] }
 0x217   :  { %v1252_v59 = vadd.f32 %v3463_v33, %v1251_v50  ;;  %2792 = vmatprep.mubr.msk.f32.mxu0 %vm752_vm1, %v1376_v42 }
 0x218   :  { %2793 = vmatmul.mubr.msk.f32.gmra.mrb[78].mxu0 %vm752_vm1, %v1377_v0  ;;  %v1379_v58 = vmax.f32 %v1257_v1, 0.0 }
 0x219   :  { %v1378_v4 = vmax.f32 %v1252_v59, 0.0  ;;  %v2696_v5 = vpop.f32.mrb[82].mxu1 }
 0x21a   :  { %v1267_v3 = vadd.f32 %v2696_v5, %v3463_v33  ;;  %v1261_v6 = vpop.f32.mrb[83].mxu1  ;;  %v2845_v5 = vld [vmem:[%s4111_s0 + $0x28] sm:$0xff] }
 0x21b   :  { %v1262_v10 = vadd.f32 %v3463_v33, %v1261_v6  ;;  %2795 = vmatprep.mubr.msk.f32.mxu0 %vm752_vm1, %v1378_v4 }
 0x21c   :  { %2796 = vmatmul.mubr.msk.f32.gmra.mrb[80].mxu0 %vm752_vm1, %v1379_v58  ;;  %v1381_v13 = vmax.f32 %v1267_v3, 0.0  ;;  %v2846_v3 = vld [vmem:[%s4111_s0 + $0x20] sm:$0xff] }
 0x21d   :  { %v1380_v2 = vmax.f32 %v1262_v10, 0.0  ;;  %v2699_v12 = vpop.f32.mrb[84].mxu1 }
 0x21e   :  { %v1277_v14 = vadd.f32 %v2699_v12, %v3463_v33  ;;  %v1271_v11 = vpop.f32.mrb[85].mxu1 }
 0x21f   :  { %v1272_v20 = vadd.f32 %v3463_v33, %v1271_v11  ;;  %2798 = vmatprep.mubr.msk.f32.mxu0 %vm752_vm1, %v1380_v2 }
 0x220   :  { %2799 = vmatmul.mubr.msk.f32.gmra.mrb[82].mxu0 %vm752_vm1, %v1381_v13  ;;  %v1383_v19 = vmax.f32 %v1277_v14, 0.0  ;;  %v2847_v14 = vld [vmem:[%s4111_s0 + $0x38] sm:$0xff] }
 0x221   :  { %v1382_v15 = vmax.f32 %v1272_v20, 0.0  ;;  %v2702_v16 = vpop.f32.mrb[86].mxu1  ;;  %v2848_v20 = vld [vmem:[%s4111_s0 + $0x30] sm:$0xff] }
 0x222   :  { %v1287_v30 = vadd.f32 %v2702_v16, %v3463_v33  ;;  %v1281_v17 = vpop.f32.mrb[87].mxu1 }
 0x223   :  { %v1282_v22 = vadd.f32 %v3463_v33, %v1281_v17  ;;  %2801 = vmatprep.mubr.msk.f32.mxu0 %vm752_vm1, %v1382_v15 }
 0x224   :  { %2802 = vmatmul.mubr.msk.f32.gmra.mrb[84].mxu0 %vm752_vm1, %v1383_v19  ;;  %v1385_v23 = vmax.f32 %v1287_v30, 0.0 }
 0x225   :  { %v1384_v29 = vmax.f32 %v1282_v22, 0.0  ;;  %v2705_v40 = vpop.f32.mrb[88].mxu1  ;;  %v2849_v22 = vld [vmem:[%s4111_s0 + $0x48] sm:$0xff] }
 0x226   :  { %v1297_v24 = vadd.f32 %v2705_v40, %v3463_v33  ;;  %v1291_v39 = vpop.f32.mrb[89].mxu1  ;;  %v2850_v40 = vld [vmem:[%s4111_s0 + $0x40] sm:$0xff] }
 0x227   :  { %v1292_v52 = vadd.f32 %v3463_v33, %v1291_v39  ;;  %2804 = vmatprep.mubr.msk.f32.mxu0 %vm752_vm1, %v1384_v29 }
 0x228   :  { %2805 = vmatmul.mubr.msk.f32.gmra.mrb[86].mxu0 %vm752_vm1, %v1385_v23  ;;  %v1387_v49 = vmax.f32 %v1297_v24, 0.0 }
 0x229   :  { %v1386_v26 = vmax.f32 %v1292_v52, 0.0  ;;  %v2708_v28 = vpop.f32.mrb[90].mxu1 }
 0x22a   :  { %v1307_v62 = vadd.f32 %v2708_v28, %v3463_v33  ;;  %v1301_v31 = vpop.f32.mrb[91].mxu1  ;;  %v2851_v28 = vld [vmem:[%s4111_s0 + $0x58] sm:$0xff] }
 0x22b   :  { %v1302_v32 = vadd.f32 %v3463_v33, %v1301_v31  ;;  %2807 = vmatprep.mubr.msk.f32.mxu0 %vm752_vm1, %v1386_v26 }
 0x22c   :  { %2808 = vmatmul.mubr.msk.f32.gmra.mrb[88].mxu0 %vm752_vm1, %v1387_v49  ;;  %v1389_v37 = vmax.f32 %v1307_v62, 0.0  ;;  %v2852_v62 = vld [vmem:[%s4111_s0 + $0x50] sm:$0xff] }
 0x22d   :  { %v1388_v61 = vmax.f32 %v1302_v32, 0.0  ;;  %v2711_v8 = vpop.f32.mrb[92].mxu1 }
 0x22e   :  { %v1317_v38 = vadd.f32 %v2711_v8, %v3463_v33  ;;  %v1311_v7 = vpop.f32.mrb[93].mxu1 }
 0x22f   :  { %v1312_v21 = vadd.f32 %v3463_v33, %v1311_v7  ;;  %2810 = vmatprep.mubr.msk.f32.mxu0 %vm752_vm1, %v1388_v61 }
 0x230   :  { %2811 = vmatmul.mubr.msk.f32.gmra.mrb[90].mxu0 %vm752_vm1, %v1389_v37  ;;  %v1391_v36 = vmax.f32 %v1317_v38, 0.0  ;;  %v2853_v38 = vld [vmem:[%s4111_s0 + $0x68] sm:$0xff] }
 0x231   :  { %v1390_v41 = vmax.f32 %v1312_v21, 0.0  ;;  %v2714_v27 = vpop.f32.mrb[94].mxu1  ;;  %v2854_v21 = vld [vmem:[%s4111_s0 + $0x60] sm:$0xff] }
 0x232   :  { %v1327_v18 = vadd.f32 %v2714_v27, %v3463_v33  ;;  %v1321_v44 = vpop.f32.mrb[95].mxu1 }
 0x233   :  { %v1322_v46 = vadd.f32 %v3463_v33, %v1321_v44  ;;  %2813 = vmatprep.mubr.msk.f32.mxu0 %vm752_vm1, %v1390_v41 }
 0x234   :  { %2814 = vmatmul.mubr.msk.f32.gmra.mrb[92].mxu0 %vm752_vm1, %v1391_v36  ;;  %v1393_v48 = vmax.f32 %v1327_v18, 0.0 }
 0x235   :  { %v1392_v47 = vmax.f32 %v1322_v46, 0.0  ;;  %v2855_v46 = vld [vmem:[%s4111_s0 + $0x78] sm:$0xff] }
 0x237   :  { %2816 = vmatprep.mubr.msk.f32.mxu0 %vm752_vm1, %v1392_v47 }
 0x238   :  { %2817 = vmatmul.mubr.msk.f32.gmra.mrb[94].mxu0 %vm752_vm1, %v1393_v48  ;;  %v2856_v48 = vld [vmem:[%s4111_s0 + $0x70] sm:$0xff] }
 0x28f   :  { %v2725_v35 = vpop.f32.mrb[32].mxu0 }
 0x290   :  { %v1669_v9 = vadd.f32 %v2725_v35, %v3596_v53  ;;  %v1663_v45 = vpop.f32.mrb[33].mxu0 }
 0x291   :  { %v1664_v33 = vadd.f32 %v3596_v53, %v1663_v45 }
 0x292   :  { %v1983_v54 = vadd.f32 %v2841_v25, %v1669_v9 }
 0x293   :  { %v1982_v56 = vadd.f32 %v2842_v55, %v1664_v33  ;;  %v2728_v57 = vpop.f32.mrb[34].mxu0 }
 0x294   :  { %2047 = vst.msk [vmem:[%s4117_s7 + $0x8] sm:$0xff] %vm99_vm0, %v1983_v54  ;;  %v1679_v34 = vadd.f32 %v2728_v57, %v3596_v53  ;;  %v1673_v43 = vpop.f32.mrb[35].mxu0  ;;  %v2857_v54 = vld [vmem:[%s4111_s0 + $0x88] sm:$0xff] }
 0x295   :  { %2046 = vst.msk [vmem:[%s4117_s7] sm:$0xff] %vm99_vm0, %v1982_v56  ;;  %v1674_v60 = vadd.f32 %v3596_v53, %v1673_v43  ;;  %v2858_v56 = vld [vmem:[%s4111_s0 + $0x80] sm:$0xff] }
 0x296   :  { %v1985_v42 = vadd.f32 %v2843_v63, %v1679_v34 }
 0x297   :  { %v1984_v0 = vadd.f32 %v2844_v51, %v1674_v60  ;;  %v2731_v1 = vpop.f32.mrb[36].mxu0 }
 0x298   :  { %2049 = vst.msk [vmem:[%s4117_s7 + $0x18] sm:$0xff] %vm99_vm0, %v1985_v42  ;;  %v1689_v50 = vadd.f32 %v2731_v1, %v3596_v53  ;;  %v1683_v59 = vpop.f32.mrb[37].mxu0  ;;  %v2859_v42 = vld [vmem:[%s4111_s0 + $0x98] sm:$0xff] }
 0x299   :  { %2048 = vst.msk [vmem:[%s4117_s7 + $0x10] sm:$0xff] %vm99_vm0, %v1984_v0  ;;  %v1684_v4 = vadd.f32 %v3596_v53, %v1683_v59  ;;  %v2860_v0 = vld [vmem:[%s4111_s0 + $0x90] sm:$0xff] }
 0x29a   :  { %v1987_v58 = vadd.f32 %v2845_v5, %v1689_v50 }
 0x29b   :  { %v1986_v6 = vadd.f32 %v2846_v3, %v1684_v4  ;;  %v2734_v10 = vpop.f32.mrb[38].mxu0 }
 0x29c   :  { %2051 = vst.msk [vmem:[%s4117_s7 + $0x28] sm:$0xff] %vm99_vm0, %v1987_v58  ;;  %v1699_v2 = vadd.f32 %v2734_v10, %v3596_v53  ;;  %v1693_v12 = vpop.f32.mrb[39].mxu0  ;;  %v2861_v58 = vld [vmem:[%s4111_s0 + $0xa8] sm:$0xff] }
 0x29d   :  { %2050 = vst.msk [vmem:[%s4117_s7 + $0x20] sm:$0xff] %vm99_vm0, %v1986_v6  ;;  %v1694_v13 = vadd.f32 %v3596_v53, %v1693_v12  ;;  %v2862_v6 = vld [vmem:[%s4111_s0 + $0xa0] sm:$0xff] }
 0x29e   :  { %v1989_v11 = vadd.f32 %v2847_v14, %v1699_v2 }
 0x29f   :  { %v1988_v15 = vadd.f32 %v2848_v20, %v1694_v13  ;;  %v2737_v16 = vpop.f32.mrb[40].mxu0 }
 0x2a0   :  { %2053 = vst.msk [vmem:[%s4117_s7 + $0x38] sm:$0xff] %vm99_vm0, %v1989_v11  ;;  %v1709_v19 = vadd.f32 %v2737_v16, %v3596_v53  ;;  %v1703_v30 = vpop.f32.mrb[41].mxu0  ;;  %v2863_v11 = vld [vmem:[%s4111_s0 + $0xb8] sm:$0xff] }
 0x2a1   :  { %2052 = vst.msk [vmem:[%s4117_s7 + $0x30] sm:$0xff] %vm99_vm0, %v1988_v15  ;;  %v1704_v17 = vadd.f32 %v3596_v53, %v1703_v30  ;;  %v2864_v15 = vld [vmem:[%s4111_s0 + $0xb0] sm:$0xff] }
 0x2a2   :  { %v1991_v29 = vadd.f32 %v2849_v22, %v1709_v19 }
 0x2a3   :  { %v1990_v23 = vadd.f32 %v2850_v40, %v1704_v17  ;;  %v2740_v24 = vpop.f32.mrb[42].mxu0 }
 0x2a4   :  { %2055 = vst.msk [vmem:[%s4117_s7 + $0x48] sm:$0xff] %vm99_vm0, %v1991_v29  ;;  %v1719_v39 = vadd.f32 %v2740_v24, %v3596_v53  ;;  %v1713_v52 = vpop.f32.mrb[43].mxu0  ;;  %v2865_v29 = vld [vmem:[%s4111_s0 + $0xc8] sm:$0xff] }
 0x2a5   :  { %2054 = vst.msk [vmem:[%s4117_s7 + $0x40] sm:$0xff] %vm99_vm0, %v1990_v23  ;;  %v1714_v26 = vadd.f32 %v3596_v53, %v1713_v52  ;;  %v2866_v23 = vld [vmem:[%s4111_s0 + $0xc0] sm:$0xff] }
 0x2a6   :  { %v1993_v49 = vadd.f32 %v2851_v28, %v1719_v39 }
 0x2a7   :  { %v1992_v31 = vadd.f32 %v2852_v62, %v1714_v26  ;;  %v2743_v32 = vpop.f32.mrb[44].mxu0 }
 0x2a8   :  { %2057 = vst.msk [vmem:[%s4117_s7 + $0x58] sm:$0xff] %vm99_vm0, %v1993_v49  ;;  %v1729_v61 = vadd.f32 %v2743_v32, %v3596_v53  ;;  %v1723_v8 = vpop.f32.mrb[45].mxu0  ;;  %v2867_v49 = vld [vmem:[%s4111_s0 + $0xd8] sm:$0xff] }
 0x2a9   :  { %2056 = vst.msk [vmem:[%s4117_s7 + $0x50] sm:$0xff] %vm99_vm0, %v1992_v31  ;;  %v1724_v37 = vadd.f32 %v3596_v53, %v1723_v8  ;;  %v2868_v31 = vld [vmem:[%s4111_s0 + $0xd0] sm:$0xff] }
 0x2aa   :  { %v1995_v7 = vadd.f32 %v2853_v38, %v1729_v61 }
 0x2ab   :  { %v1994_v41 = vadd.f32 %v2854_v21, %v1724_v37  ;;  %v2746_v27 = vpop.f32.mrb[46].mxu0 }
 0x2ac   :  { %2059 = vst.msk [vmem:[%s4117_s7 + $0x68] sm:$0xff] %vm99_vm0, %v1995_v7  ;;  %v1739_v36 = vadd.f32 %v2746_v27, %v3596_v53  ;;  %v1733_v18 = vpop.f32.mrb[47].mxu0  ;;  %v2869_v7 = vld [vmem:[%s4111_s0 + $0xe8] sm:$0xff] }
 0x2ad   :  { %2058 = vst.msk [vmem:[%s4117_s7 + $0x60] sm:$0xff] %vm99_vm0, %v1994_v41  ;;  %v1734_v44 = vadd.f32 %v3596_v53, %v1733_v18  ;;  %v2870_v41 = vld [vmem:[%s4111_s0 + $0xe0] sm:$0xff] }
 0x2ae   :  { %v1997_v47 = vadd.f32 %v2855_v46, %v1739_v36 }
 0x2af   :  { %v1996_v35 = vadd.f32 %v2856_v48, %v1734_v44  ;;  %v2749_v9 = vpop.f32.mrb[48].mxu0 }
 0x2b0   :  { %2061 = vst.msk [vmem:[%s4117_s7 + $0x78] sm:$0xff] %vm99_vm0, %v1997_v47  ;;  %v1749_v45 = vadd.f32 %v2749_v9, %v3596_v53  ;;  %v1743_v33 = vpop.f32.mrb[49].mxu0  ;;  %v2871_v47 = vld [vmem:[%s4111_s0 + $0xf8] sm:$0xff] }
 0x2b1   :  { %2060 = vst.msk [vmem:[%s4117_s7 + $0x70] sm:$0xff] %vm99_vm0, %v1996_v35  ;;  %v1744_v25 = vadd.f32 %v3596_v53, %v1743_v33  ;;  %v2872_v35 = vld [vmem:[%s4111_s0 + $0xf0] sm:$0xff] }
 0x2b2   :  { %v1999_v55 = vadd.f32 %v2857_v54, %v1749_v45 }
 0x2b3   :  { %v1998_v57 = vadd.f32 %v2858_v56, %v1744_v25  ;;  %v2752_v34 = vpop.f32.mrb[50].mxu0 }
 0x2b4   :  { %2063 = vst.msk [vmem:[%s4117_s7 + $0x88] sm:$0xff] %vm99_vm0, %v1999_v55  ;;  %v1759_v43 = vadd.f32 %v2752_v34, %v3596_v53  ;;  %v1753_v60 = vpop.f32.mrb[51].mxu0  ;;  %v2873_v55 = vld [vmem:[%s4111_s0 + $0x108] sm:$0xff] }
 0x2b5   :  { %2062 = vst.msk [vmem:[%s4117_s7 + $0x80] sm:$0xff] %vm99_vm0, %v1998_v57  ;;  %v1754_v63 = vadd.f32 %v3596_v53, %v1753_v60  ;;  %v2874_v57 = vld [vmem:[%s4111_s0 + $0x100] sm:$0xff] }
 0x2b6   :  { %v2001_v51 = vadd.f32 %v2859_v42, %v1759_v43 }
 0x2b7   :  { %v2000_v1 = vadd.f32 %v2860_v0, %v1754_v63  ;;  %v2755_v50 = vpop.f32.mrb[52].mxu0 }
 0x2b8   :  { %2065 = vst.msk [vmem:[%s4117_s7 + $0x98] sm:$0xff] %vm99_vm0, %v2001_v51  ;;  %v1769_v59 = vadd.f32 %v2755_v50, %v3596_v53  ;;  %v1763_v4 = vpop.f32.mrb[53].mxu0  ;;  %v2875_v51 = vld [vmem:[%s4111_s0 + $0x118] sm:$0xff] }
 0x2b9   :  { %2064 = vst.msk [vmem:[%s4117_s7 + $0x90] sm:$0xff] %vm99_vm0, %v2000_v1  ;;  %v1764_v5 = vadd.f32 %v3596_v53, %v1763_v4  ;;  %v2876_v1 = vld [vmem:[%s4111_s0 + $0x110] sm:$0xff] }
 0x2ba   :  { %v2003_v3 = vadd.f32 %v2861_v58, %v1769_v59 }
 0x2bb   :  { %v2002_v10 = vadd.f32 %v2862_v6, %v1764_v5  ;;  %v2758_v2 = vpop.f32.mrb[54].mxu0 }
 0x2bc   :  { %2067 = vst.msk [vmem:[%s4117_s7 + $0xa8] sm:$0xff] %vm99_vm0, %v2003_v3  ;;  %v1779_v12 = vadd.f32 %v2758_v2, %v3596_v53  ;;  %v1773_v13 = vpop.f32.mrb[55].mxu0  ;;  %v2877_v3 = vld [vmem:[%s4111_s0 + $0x128] sm:$0xff] }
 0x2bd   :  { %2066 = vst.msk [vmem:[%s4117_s7 + $0xa0] sm:$0xff] %vm99_vm0, %v2002_v10  ;;  %v1774_v14 = vadd.f32 %v3596_v53, %v1773_v13  ;;  %v2878_v10 = vld [vmem:[%s4111_s0 + $0x120] sm:$0xff] }
 0x2be   :  { %v2005_v20 = vadd.f32 %v2863_v11, %v1779_v12 }
 0x2bf   :  { %v2004_v16 = vadd.f32 %v2864_v15, %v1774_v14  ;;  %v2761_v19 = vpop.f32.mrb[56].mxu0 }
 0x2c0   :  { %2069 = vst.msk [vmem:[%s4117_s7 + $0xb8] sm:$0xff] %vm99_vm0, %v2005_v20  ;;  %v1789_v30 = vadd.f32 %v2761_v19, %v3596_v53  ;;  %v1783_v17 = vpop.f32.mrb[57].mxu0  ;;  %v2879_v20 = vld [vmem:[%s4111_s0 + $0x138] sm:$0xff] }
 0x2c1   :  { %2068 = vst.msk [vmem:[%s4117_s7 + $0xb0] sm:$0xff] %vm99_vm0, %v2004_v16  ;;  %v1784_v22 = vadd.f32 %v3596_v53, %v1783_v17  ;;  %v2880_v16 = vld [vmem:[%s4111_s0 + $0x130] sm:$0xff] }
 0x2c2   :  { %v2007_v40 = vadd.f32 %v2865_v29, %v1789_v30 }
 0x2c3   :  { %v2006_v24 = vadd.f32 %v2866_v23, %v1784_v22  ;;  %v2764_v39 = vpop.f32.mrb[58].mxu0 }
 0x2c4   :  { %2071 = vst.msk [vmem:[%s4117_s7 + $0xc8] sm:$0xff] %vm99_vm0, %v2007_v40  ;;  %v1799_v52 = vadd.f32 %v2764_v39, %v3596_v53  ;;  %v1793_v26 = vpop.f32.mrb[59].mxu0  ;;  %v2881_v40 = vld [vmem:[%s4111_s0 + $0x148] sm:$0xff] }
 0x2c5   :  { %2070 = vst.msk [vmem:[%s4117_s7 + $0xc0] sm:$0xff] %vm99_vm0, %v2006_v24  ;;  %v1794_v28 = vadd.f32 %v3596_v53, %v1793_v26  ;;  %v2882_v24 = vld [vmem:[%s4111_s0 + $0x140] sm:$0xff] }
 0x2c6   :  { %v2009_v62 = vadd.f32 %v2867_v49, %v1799_v52 }
 0x2c7   :  { %v2008_v32 = vadd.f32 %v2868_v31, %v1794_v28  ;;  %v2767_v61 = vpop.f32.mrb[60].mxu0 }
 0x2c8   :  { %2073 = vst.msk [vmem:[%s4117_s7 + $0xd8] sm:$0xff] %vm99_vm0, %v2009_v62  ;;  %v1809_v8 = vadd.f32 %v2767_v61, %v3596_v53  ;;  %v1803_v37 = vpop.f32.mrb[61].mxu0  ;;  %v2883_v62 = vld [vmem:[%s4111_s0 + $0x158] sm:$0xff] }
 0x2c9   :  { %2072 = vst.msk [vmem:[%s4117_s7 + $0xd0] sm:$0xff] %vm99_vm0, %v2008_v32  ;;  %v1804_v38 = vadd.f32 %v3596_v53, %v1803_v37  ;;  %v2884_v32 = vld [vmem:[%s4111_s0 + $0x150] sm:$0xff] }
 0x2ca   :  { %v2011_v21 = vadd.f32 %v2869_v7, %v1809_v8 }
 0x2cb   :  { %v2010_v27 = vadd.f32 %v2870_v41, %v1804_v38  ;;  %v2770_v36 = vpop.f32.mrb[62].mxu0 }
 0x2cc   :  { %2075 = vst.msk [vmem:[%s4117_s7 + $0xe8] sm:$0xff] %vm99_vm0, %v2011_v21  ;;  %v1819_v18 = vadd.f32 %v2770_v36, %v3596_v53  ;;  %v1813_v44 = vpop.f32.mrb[63].mxu0  ;;  %v2885_v21 = vld [vmem:[%s4111_s0 + $0x168] sm:$0xff] }
 0x2cd   :  { %2074 = vst.msk [vmem:[%s4117_s7 + $0xe0] sm:$0xff] %vm99_vm0, %v2010_v27  ;;  %v1814_v46 = vadd.f32 %v3596_v53, %v1813_v44  ;;  %v2886_v27 = vld [vmem:[%s4111_s0 + $0x160] sm:$0xff] }
 0x2ce   :  { %v2013_v48 = vadd.f32 %v2871_v47, %v1819_v18 }
 0x2cf   :  { %v2012_v9 = vadd.f32 %v2872_v35, %v1814_v46  ;;  %v2773_v45 = vpop.f32.mrb[64].mxu0 }
 0x2d0   :  { %2077 = vst.msk [vmem:[%s4117_s7 + $0xf8] sm:$0xff] %vm99_vm0, %v2013_v48  ;;  %v1829_v33 = vadd.f32 %v2773_v45, %v3596_v53  ;;  %v1823_v25 = vpop.f32.mrb[65].mxu0  ;;  %v2887_v48 = vld [vmem:[%s4111_s0 + $0x178] sm:$0xff] }
 0x2d1   :  { %2076 = vst.msk [vmem:[%s4117_s7 + $0xf0] sm:$0xff] %vm99_vm0, %v2012_v9  ;;  %v1824_v54 = vadd.f32 %v3596_v53, %v1823_v25  ;;  %v2888_v9 = vld [vmem:[%s4111_s0 + $0x170] sm:$0xff] }
 0x2d2   :  { %v2015_v56 = vadd.f32 %v2873_v55, %v1829_v33 }
 0x2d3   :  { %v2014_v34 = vadd.f32 %v2874_v57, %v1824_v54  ;;  %v2776_v43 = vpop.f32.mrb[66].mxu0 }
 0x2d4   :  { %2079 = vst.msk [vmem:[%s4117_s7 + $0x108] sm:$0xff] %vm99_vm0, %v2015_v56  ;;  %v1839_v60 = vadd.f32 %v2776_v43, %v3596_v53  ;;  %v1833_v63 = vpop.f32.mrb[67].mxu0  ;;  %v2889_v56 = vld [vmem:[%s4111_s0 + $0x188] sm:$0xff] }
 0x2d5   :  { %2078 = vst.msk [vmem:[%s4117_s7 + $0x100] sm:$0xff] %vm99_vm0, %v2014_v34  ;;  %v1834_v42 = vadd.f32 %v3596_v53, %v1833_v63  ;;  %v2890_v34 = vld [vmem:[%s4111_s0 + $0x180] sm:$0xff] }
 0x2d6   :  { %v2017_v0 = vadd.f32 %v2875_v51, %v1839_v60 }
 0x2d7   :  { %v2016_v50 = vadd.f32 %v2876_v1, %v1834_v42  ;;  %v2779_v59 = vpop.f32.mrb[68].mxu0 }
 0x2d8   :  { %2081 = vst.msk [vmem:[%s4117_s7 + $0x118] sm:$0xff] %vm99_vm0, %v2017_v0  ;;  %v1849_v4 = vadd.f32 %v2779_v59, %v3596_v53  ;;  %v1843_v5 = vpop.f32.mrb[69].mxu0  ;;  %v2891_v0 = vld [vmem:[%s4111_s0 + $0x198] sm:$0xff] }
 0x2d9   :  { %2080 = vst.msk [vmem:[%s4117_s7 + $0x110] sm:$0xff] %vm99_vm0, %v2016_v50  ;;  %v1844_v58 = vadd.f32 %v3596_v53, %v1843_v5  ;;  %v2892_v50 = vld [vmem:[%s4111_s0 + $0x190] sm:$0xff] }
 0x2da   :  { %v2019_v6 = vadd.f32 %v2877_v3, %v1849_v4 }
 0x2db   :  { %v2018_v2 = vadd.f32 %v2878_v10, %v1844_v58  ;;  %v2782_v12 = vpop.f32.mrb[70].mxu0 }
 0x2dc   :  { %2083 = vst.msk [vmem:[%s4117_s7 + $0x128] sm:$0xff] %vm99_vm0, %v2019_v6  ;;  %v1859_v13 = vadd.f32 %v2782_v12, %v3596_v53  ;;  %v1853_v14 = vpop.f32.mrb[71].mxu0  ;;  %v2893_v6 = vld [vmem:[%s4111_s0 + $0x1a8] sm:$0xff] }
 0x2dd   :  { %2082 = vst.msk [vmem:[%s4117_s7 + $0x120] sm:$0xff] %vm99_vm0, %v2018_v2  ;;  %v1854_v11 = vadd.f32 %v3596_v53, %v1853_v14  ;;  %v2894_v2 = vld [vmem:[%s4111_s0 + $0x1a0] sm:$0xff] }
 0x2de   :  { %v2021_v15 = vadd.f32 %v2879_v20, %v1859_v13 }
 0x2df   :  { %v2020_v19 = vadd.f32 %v2880_v16, %v1854_v11  ;;  %v2785_v30 = vpop.f32.mrb[72].mxu0 }
 0x2e0   :  { %2085 = vst.msk [vmem:[%s4117_s7 + $0x138] sm:$0xff] %vm99_vm0, %v2021_v15  ;;  %v1869_v17 = vadd.f32 %v2785_v30, %v3596_v53  ;;  %v1863_v22 = vpop.f32.mrb[73].mxu0  ;;  %v2895_v15 = vld [vmem:[%s4111_s0 + $0x1b8] sm:$0xff] }
 0x2e1   :  { %2084 = vst.msk [vmem:[%s4117_s7 + $0x130] sm:$0xff] %vm99_vm0, %v2020_v19  ;;  %v1864_v29 = vadd.f32 %v3596_v53, %v1863_v22  ;;  %v2896_v19 = vld [vmem:[%s4111_s0 + $0x1b0] sm:$0xff] }
 0x2e2   :  { %v2023_v23 = vadd.f32 %v2881_v40, %v1869_v17 }
 0x2e3   :  { %v2022_v39 = vadd.f32 %v2882_v24, %v1864_v29  ;;  %v2788_v52 = vpop.f32.mrb[74].mxu0 }
 0x2e4   :  { %2087 = vst.msk [vmem:[%s4117_s7 + $0x148] sm:$0xff] %vm99_vm0, %v2023_v23  ;;  %v1879_v26 = vadd.f32 %v2788_v52, %v3596_v53  ;;  %v1873_v28 = vpop.f32.mrb[75].mxu0  ;;  %v2897_v23 = vld [vmem:[%s4111_s0 + $0x1c8] sm:$0xff] }
 0x2e5   :  { %2086 = vst.msk [vmem:[%s4117_s7 + $0x140] sm:$0xff] %vm99_vm0, %v2022_v39  ;;  %v1874_v49 = vadd.f32 %v3596_v53, %v1873_v28  ;;  %v2898_v39 = vld [vmem:[%s4111_s0 + $0x1c0] sm:$0xff] }
 0x2e6   :  { %v2025_v31 = vadd.f32 %v2883_v62, %v1879_v26 }
 0x2e7   :  { %v2024_v61 = vadd.f32 %v2884_v32, %v1874_v49  ;;  %v2791_v8 = vpop.f32.mrb[76].mxu0 }
 0x2e8   :  { %2089 = vst.msk [vmem:[%s4117_s7 + $0x158] sm:$0xff] %vm99_vm0, %v2025_v31  ;;  %v1889_v37 = vadd.f32 %v2791_v8, %v3596_v53  ;;  %v1883_v38 = vpop.f32.mrb[77].mxu0  ;;  %v2899_v31 = vld [vmem:[%s4111_s0 + $0x1d8] sm:$0xff] }
 0x2e9   :  { %2088 = vst.msk [vmem:[%s4117_s7 + $0x150] sm:$0xff] %vm99_vm0, %v2024_v61  ;;  %v1884_v7 = vadd.f32 %v3596_v53, %v1883_v38  ;;  %v2900_v61 = vld [vmem:[%s4111_s0 + $0x1d0] sm:$0xff] }
 0x2ea   :  { %v2027_v41 = vadd.f32 %v2885_v21, %v1889_v37 }
 0x2eb   :  { %v2026_v36 = vadd.f32 %v2886_v27, %v1884_v7  ;;  %v2794_v18 = vpop.f32.mrb[78].mxu0 }
 0x2ec   :  { %2091 = vst.msk [vmem:[%s4117_s7 + $0x168] sm:$0xff] %vm99_vm0, %v2027_v41  ;;  %v1899_v44 = vadd.f32 %v2794_v18, %v3596_v53  ;;  %v1893_v46 = vpop.f32.mrb[79].mxu0  ;;  %v2901_v41 = vld [vmem:[%s4111_s0 + $0x1e8] sm:$0xff] }
 0x2ed   :  { %2090 = vst.msk [vmem:[%s4117_s7 + $0x160] sm:$0xff] %vm99_vm0, %v2026_v36  ;;  %v1894_v47 = vadd.f32 %v3596_v53, %v1893_v46  ;;  %v2902_v36 = vld [vmem:[%s4111_s0 + $0x1e0] sm:$0xff] }
 0x2ee   :  { %v2029_v35 = vadd.f32 %v2887_v48, %v1899_v44 }
 0x2ef   :  { %v2028_v45 = vadd.f32 %v2888_v9, %v1894_v47  ;;  %v2797_v33 = vpop.f32.mrb[80].mxu0 }
 0x2f0   :  { %2093 = vst.msk [vmem:[%s4117_s7 + $0x178] sm:$0xff] %vm99_vm0, %v2029_v35  ;;  %v1909_v25 = vadd.f32 %v2797_v33, %v3596_v53  ;;  %v1903_v54 = vpop.f32.mrb[81].mxu0  ;;  %v2903_v35 = vld [vmem:[%s4111_s0 + $0x1f8] sm:$0xff] }
 0x2f1   :  { %2092 = vst.msk [vmem:[%s4117_s7 + $0x170] sm:$0xff] %vm99_vm0, %v2028_v45  ;;  %v1904_v55 = vadd.f32 %v3596_v53, %v1903_v54  ;;  %v2904_v45 = vld [vmem:[%s4111_s0 + $0x1f0] sm:$0xff] }
 0x2f2   :  { %v2031_v57 = vadd.f32 %v2889_v56, %v1909_v25 }
 0x2f3   :  { %v2030_v43 = vadd.f32 %v2890_v34, %v1904_v55  ;;  %v2800_v60 = vpop.f32.mrb[82].mxu0 }
 0x2f4   :  { %2095 = vst.msk [vmem:[%s4117_s7 + $0x188] sm:$0xff] %vm99_vm0, %v2031_v57  ;;  %v1919_v63 = vadd.f32 %v2800_v60, %v3596_v53  ;;  %v1913_v42 = vpop.f32.mrb[83].mxu0 }
 0x2f5   :  { %2094 = vst.msk [vmem:[%s4117_s7 + $0x180] sm:$0xff] %vm99_vm0, %v2030_v43  ;;  %v1914_v51 = vadd.f32 %v3596_v53, %v1913_v42 }
 0x2f6   :  { %v2033_v1 = vadd.f32 %v2891_v0, %v1919_v63 }
 0x2f7   :  { %v2032_v59 = vadd.f32 %v2892_v50, %v1914_v51  ;;  %v2803_v4 = vpop.f32.mrb[84].mxu0 }
 0x2f8   :  { %2097 = vst.msk [vmem:[%s4117_s7 + $0x198] sm:$0xff] %vm99_vm0, %v2033_v1  ;;  %v1929_v5 = vadd.f32 %v2803_v4, %v3596_v53  ;;  %v1923_v58 = vpop.f32.mrb[85].mxu0 }
 0x2f9   :  { %2096 = vst.msk [vmem:[%s4117_s7 + $0x190] sm:$0xff] %vm99_vm0, %v2032_v59  ;;  %v1924_v3 = vadd.f32 %v3596_v53, %v1923_v58 }
 0x2fa   :  { %v2035_v10 = vadd.f32 %v2893_v6, %v1929_v5 }
 0x2fb   :  { %v2034_v12 = vadd.f32 %v2894_v2, %v1924_v3  ;;  %v2806_v13 = vpop.f32.mrb[86].mxu0 }
 0x2fc   :  { %2099 = vst.msk [vmem:[%s4117_s7 + $0x1a8] sm:$0xff] %vm99_vm0, %v2035_v10  ;;  %v1939_v14 = vadd.f32 %v2806_v13, %v3596_v53  ;;  %v1933_v11 = vpop.f32.mrb[87].mxu0 }
 0x2fd   :  { %2098 = vst.msk [vmem:[%s4117_s7 + $0x1a0] sm:$0xff] %vm99_vm0, %v2034_v12  ;;  %v1934_v20 = vadd.f32 %v3596_v53, %v1933_v11 }
 0x2fe   :  { %v2037_v16 = vadd.f32 %v2895_v15, %v1939_v14 }
 0x2ff   :  { %v2036_v30 = vadd.f32 %v2896_v19, %v1934_v20  ;;  %v2809_v17 = vpop.f32.mrb[88].mxu0 }
 0x300   :  { %2101 = vst.msk [vmem:[%s4117_s7 + $0x1b8] sm:$0xff] %vm99_vm0, %v2037_v16  ;;  %v1949_v22 = vadd.f32 %v2809_v17, %v3596_v53  ;;  %v1943_v29 = vpop.f32.mrb[89].mxu0 }
 0x301   :  { %2100 = vst.msk [vmem:[%s4117_s7 + $0x1b0] sm:$0xff] %vm99_vm0, %v2036_v30  ;;  %v1944_v40 = vadd.f32 %v3596_v53, %v1943_v29 }
 0x302   :  { %v2039_v24 = vadd.f32 %v2897_v23, %v1949_v22 }
 0x303   :  { %v2038_v52 = vadd.f32 %v2898_v39, %v1944_v40  ;;  %v2812_v26 = vpop.f32.mrb[90].mxu0 }
 0x304   :  { %2103 = vst.msk [vmem:[%s4117_s7 + $0x1c8] sm:$0xff] %vm99_vm0, %v2039_v24  ;;  %v1959_v28 = vadd.f32 %v2812_v26, %v3596_v53  ;;  %v1953_v49 = vpop.f32.mrb[91].mxu0 }
 0x305   :  { %2102 = vst.msk [vmem:[%s4117_s7 + $0x1c0] sm:$0xff] %vm99_vm0, %v2038_v52  ;;  %v1954_v62 = vadd.f32 %v3596_v53, %v1953_v49 }
 0x306   :  { %v2041_v32 = vadd.f32 %v2899_v31, %v1959_v28 }
 0x307   :  { %v2040_v8 = vadd.f32 %v2900_v61, %v1954_v62  ;;  %v2815_v37 = vpop.f32.mrb[92].mxu0 }
 0x308   :  { %2105 = vst.msk [vmem:[%s4117_s7 + $0x1d8] sm:$0xff] %vm99_vm0, %v2041_v32  ;;  %v1969_v38 = vadd.f32 %v2815_v37, %v3596_v53  ;;  %v1963_v7 = vpop.f32.mrb[93].mxu0 }
 0x309   :  { %2104 = vst.msk [vmem:[%s4117_s7 + $0x1d0] sm:$0xff] %vm99_vm0, %v2040_v8  ;;  %v1964_v21 = vadd.f32 %v3596_v53, %v1963_v7 }
 0x30a   :  { %v2043_v27 = vadd.f32 %v2901_v41, %v1969_v38 }
 0x30b   :  { %v2042_v18 = vadd.f32 %v2902_v36, %v1964_v21  ;;  %v2818_v44 = vpop.f32.mrb[94].mxu0 }
 0x30c   :  { %2107 = vst.msk [vmem:[%s4117_s7 + $0x1e8] sm:$0xff] %vm99_vm0, %v2043_v27  ;;  %v1979_v46 = vadd.f32 %v2818_v44, %v3596_v53  ;;  %v1973_v47 = vpop.f32.mrb[95].mxu0 }
 0x30d   :  { %2106 = vst.msk [vmem:[%s4117_s7 + $0x1e0] sm:$0xff] %vm99_vm0, %v2042_v18  ;;  %v1974_v48 = vadd.f32 %v3596_v53, %v1973_v47 }
 0x30e   :  { %v2045_v9 = vadd.f32 %v2903_v35, %v1979_v46 }
 0x30f   :  { %v2044_v33 = vadd.f32 %v2904_v45, %v1974_v48 }
 0x310   :  { %2109 = vst.msk [vmem:[%s4117_s7 + $0x1f8] sm:$0xff] %vm99_vm0, %v2045_v9 }
 0x311   :  { %2108 = vst.msk [vmem:[%s4117_s7 + $0x1f0] sm:$0xff] %vm99_vm0, %v2044_v33 }

</bundles_post_ra>
